<compile_context>
chip_gen: v7x
topology: tpu7x:2x2x1
jax: 0.10.0
libtpu: 0.0.40
codegen_flags: <defaults>
</compile_context>

<pallas_src>
import jax
import jax.numpy as jnp
from jax import lax
from jax.experimental import pallas as pl
from jax.experimental.pallas import tpu as pltpu


def _make_kernel(bow_dtype):
    def kernel(ids_ref, len_ref, emb_ref, out_ref, acc_ref):
        """One (node-tile, vocab-chunk) step of the masked-mean embedding lookup.

        ids_ref : (TN, W)   int32  token ids; padded slots hold -1 (match nothing)
        len_ref : (TN, 1)   f32    number of real tokens per node
        emb_ref : (Vc, E)   bf16   one vocab chunk of the embedding table
        out_ref : (TN, E)   f32    mean-pooled utterance embedding per node
        acc_ref : (TN, E)   f32    VMEM accumulator, persistent across the k axis
        """
        k = pl.program_id(1)

        @pl.when(k == 0)
        def _():
            acc_ref[...] = jnp.zeros_like(acc_ref)

        TN, W = ids_ref.shape
        Vc, _ = emb_ref.shape

        ids = ids_ref[...]                                        # (TN, W) int32
        # Global vocab id carried by each lane of this chunk.
        lane_iota = k * Vc + lax.broadcasted_iota(jnp.int32, (TN, Vc), 1)

        # Bag-of-words counts for this chunk: bow[n, v] = #{w : ids[n, w] == k*Vc+v}.
        # Built word-by-word so only one (TN, Vc) slab is live; bf16 counts are exact
        # for W <= 256 and halve vreg/VALU cost on v6e/v7x.
        bow = jnp.zeros((TN, Vc), bow_dtype)
        for w in range(W):                                        # W is small & static
            col = ids[:, w:w + 1]                                 # (TN, 1)
            bow = bow + (col == lane_iota).astype(bow_dtype)      # pad id -1 never matches

        bow = bow.astype(emb_ref.dtype)                           # no-op when already bf16
        acc_ref[...] += jnp.dot(bow, emb_ref[...],
                                preferred_element_type=jnp.float32)

        @pl.when(k == pl.num_programs(1) - 1)
        def _():
            count = jnp.maximum(len_ref[...], 1.0)                # (TN, 1)
            # approx=True -> EUP slot (idle here), essentially free.
            out_ref[...] = acc_ref[...] * pl.reciprocal(count, approx=True)

    return kernel


def stupid_embedder_forward(token_ids, lengths, emb_table, *, node_tile=128,
                            vocab_chunk=512, table_dtype=jnp.bfloat16,
                            bow_dtype=jnp.bfloat16):
    """(num_nodes, max_words) padded ids + per-node lengths -> (num_nodes, embed_dim)."""
    N, W = token_ids.shape
    V, E = emb_table.shape
    node_tile = min(node_tile, N)
    vocab_chunk = min(vocab_chunk, V)
    assert N % node_tile == 0, "num_nodes must be a multiple of node_tile"
    assert V % vocab_chunk == 0, "vocab size must be a multiple of vocab_chunk"
    if jnp.dtype(bow_dtype) == jnp.dtype(jnp.bfloat16):
        assert W <= 256, "bf16 bag-of-words counts are exact only for W <= 256"

    lengths_col = lengths.reshape(N, 1).astype(jnp.float32)
    emb = emb_table.astype(table_dtype)   # bf16 feeds the MXU at full rate on v6e/v7x

    if vocab_chunk == V:
        # Whole table in one constant-index block: it is fetched exactly once, so
        # don't let Pallas reserve a second buffer for it.
        table_spec = pl.BlockSpec((vocab_chunk, E), lambda i, k: (0, 0),
                                  pipeline_mode=pl.Buffered(1))
        table_bufs = 1
    else:
        # Chunks rotate along k; default double-buffering pipelines table DMA.
        table_spec = pl.BlockSpec((vocab_chunk, E), lambda i, k: (k, 0))
        table_bufs = 2

    tb = jnp.dtype(table_dtype).itemsize
    est_vmem = (table_bufs * vocab_chunk * E * tb        # table chunk buffer(s)
                + 2 * node_tile * (W * 4 + 4)            # ids + lengths tiles (2-buf)
                + 2 * node_tile * E * 4                  # output tiles (2-buf)
                + node_tile * E * 4                      # f32 accumulator scratch
                + node_tile * vocab_chunk * 4)           # in-kernel bow slab
    # Leave headroom below physical VMEM (64 MiB/TC on v7x) for compiler scratch.
    vmem_limit = int(min(max(est_vmem + (4 << 20), 16 << 20), 48 << 20))

    grid = (N // node_tile, V // vocab_chunk)
    kernel = _make_kernel(jnp.dtype(bow_dtype))

    return pl.pallas_call(
        kernel,
        out_shape=jax.ShapeDtypeStruct((N, E), jnp.float32),
        grid_spec=pltpu.PrefetchScalarGridSpec(
            num_scalar_prefetch=0,
            grid=grid,
            in_specs=[
                pl.BlockSpec((node_tile, W), lambda i, k: (i, 0)),   # token id tile
                pl.BlockSpec((node_tile, 1), lambda i, k: (i, 0)),   # per-node lengths
                table_spec,                                          # table chunk
            ],
            out_specs=pl.BlockSpec((node_tile, E), lambda i, k: (i, 0)),
            scratch_shapes=[pltpu.VMEM((node_tile, E), jnp.float32)],
        ),
        compiler_params=pltpu.CompilerParams(
            dimension_semantics=("parallel", "arbitrary"),
            vmem_limit_bytes=vmem_limit),
    )(token_ids, lengths_col, emb)


if __name__ == "__main__":
    key = jax.random.PRNGKey(0)
    k_emb, k_ids, k_len = jax.random.split(key, 3)

    # Small, deterministic shapes consistent with the module (utterance embed dim 128).
    num_nodes, max_words, vocab, embed_dim = 256, 8, 256, 128
    target_dim = 32  # self.fc / self.dropout exist in __init__ but forward() never uses them

    emb_table = jax.random.normal(k_emb, (vocab, embed_dim), dtype=jnp.float32)
    token_ids = jax.random.randint(k_ids, (num_nodes, max_words), 0, vocab,
                                   dtype=jnp.int32)
    lengths = jax.random.randint(k_len, (num_nodes,), 1, max_words + 1,
                                 dtype=jnp.int32)
    # Padded word slots hold id -1 so they match no vocab row inside the kernel.
    pad = jnp.arange(max_words)[None, :] >= lengths[:, None]
    token_ids = jnp.where(pad, -1, token_ids)

    # fc / dropout parameters exist for completeness but — exactly like the PyTorch
    # forward() — they are never applied.
    _fc_w = jax.random.normal(jax.random.PRNGKey(1), (target_dim, embed_dim),
                              dtype=jnp.float32) * 0.02
    _fc_b = jnp.zeros((target_dim,), dtype=jnp.float32)

    # Pure-JAX reference: gather + masked mean, using the same bf16 table quantization
    # the kernel's MXU path sees (tolerance covers the approx EUP reciprocal).
    emb_q = emb_table.astype(jnp.bfloat16).astype(jnp.float32)
    safe_ids = jnp.where(pad, 0, token_ids)
    gathered = jnp.take(emb_q, safe_ids, axis=0)                       # (N, W, E)
    mask = (~pad).astype(jnp.float32)
    ref = (gathered * mask[:, :, None]).sum(axis=1) / jnp.maximum(
        lengths[:, None].astype(jnp.float32), 1.0)

    # Path 1: vocab-chunked reduction (grid (2, 2) -> >= 2 steps per v7x TensorCore).
    out_chunked = stupid_embedder_forward(token_ids, lengths, emb_table,
                                          node_tile=128, vocab_chunk=128)
    out_chunked = jax.block_until_ready(out_chunked)
    assert out_chunked.shape == (num_nodes, embed_dim)
    assert jnp.allclose(out_chunked, ref, atol=1e-2, rtol=1e-2), (
        float(jnp.max(jnp.abs(out_chunked - ref))))

    # Path 2: whole table as one constant chunk -> single-buffered (pl.Buffered(1)).
    out_single = stupid_embedder_forward(token_ids, lengths, emb_table,
                                         node_tile=128, vocab_chunk=vocab)
    out_single = jax.block_until_ready(out_single)
    assert jnp.allclose(out_single, ref, atol=1e-2, rtol=1e-2), (
        float(jnp.max(jnp.abs(out_single - ref))))

    print("KERNEL_OK")
</pallas_src>

<mosaic_0001>
module attributes {stable_mosaic.version = 11 : i64} {
  func.func @kernel(%arg0: i32, %arg1: i32, %arg2: memref<128x8xi32, #tpu.memory_space<vmem>>, %arg3: memref<128x1xf32, #tpu.memory_space<vmem>>, %arg4: memref<128x128xbf16, #tpu.memory_space<vmem>>, %arg5: memref<128x128xf32, #tpu.memory_space<vmem>>, %arg6: memref<128x128xf32, #tpu.memory_space<vmem>>) attributes {dimension_semantics = [#tpu.dimension_semantics<parallel>, #tpu.dimension_semantics<arbitrary>], iteration_bounds = array<i64: 2, 2>, scalar_prefetch = 0 : i64, scratch_operands = 1 : i64, tpu.core_type = #tpu.core_type<tc>, window_params = [{transform_indices = @transform_0, window_bounds = array<i64: 128, 8>}, {transform_indices = @transform_1, window_bounds = array<i64: 128, 1>}, {transform_indices = @transform_2, window_bounds = array<i64: 128, 128>}, {transform_indices = @transform_3, window_bounds = array<i64: 128, 128>}]} {
    %c0_i32 = arith.constant 0 : i32
    %0 = arith.cmpi eq, %arg1, %c0_i32 : i32
    %1 = arith.extui %0 : i1 to i32
    %c0_i32_0 = arith.constant 0 : i32
    %2 = arith.cmpi ne, %1, %c0_i32_0 : i32
    scf.if %2 {
      %cst_10 = arith.constant 0.000000e+00 : f32
      %73 = vector.broadcast %cst_10 : f32 to vector<128x128xf32>
      %c0_11 = arith.constant 0 : index
      %c0_12 = arith.constant 0 : index
      %74 = vector.load %arg6[%c0_11, %c0_12] : memref<128x128xf32, #tpu.memory_space<vmem>>, vector<128x128xf32>
      tpu.vector_store %arg6[%c0_11, %c0_12], %73 {strides = array<i32>} : memref<128x128xf32, #tpu.memory_space<vmem>>, vector<128x128xf32>,
    } else {
    }
    %c0 = arith.constant 0 : index
    %c0_1 = arith.constant 0 : index
    %3 = vector.load %arg2[%c0, %c0_1] : memref<128x8xi32, #tpu.memory_space<vmem>>, vector<128x8xi32>
    %c128_i32 = arith.constant 128 : i32
    %4 = arith.muli %arg1, %c128_i32 : i32
    %5 = tpu.iota {dimensions = array<i32: 1>} : vector<128x128xi32>
    %6 = vector.broadcast %4 : i32 to vector<128x128xi32>
    %7 = arith.addi %6, %5 : vector<128x128xi32>
    %cst = arith.constant 0.000000e+00 : bf16
    %8 = vector.broadcast %cst : bf16 to vector<128x128xbf16>
    %9 = vector.extract_strided_slice %3 {offsets = [0, 0], sizes = [128, 1], strides = [1, 1]} : vector<128x8xi32> to vector<128x1xi32>
    %10 = vector.broadcast %9 : vector<128x1xi32> to vector<128x128xi32>
    %11 = arith.cmpi eq, %10, %7 : vector<128x128xi32>
    %12 = arith.extui %11 : vector<128x128xi1> to vector<128x128xi32>
    %13 = arith.sitofp %12 : vector<128x128xi32> to vector<128x128xf32>
    %14 = arith.truncf %13 : vector<128x128xf32> to vector<128x128xbf16>
    %15 = arith.addf %8, %14 : vector<128x128xbf16>
    %16 = vector.extract_strided_slice %3 {offsets = [0, 1], sizes = [128, 1], strides = [1, 1]} : vector<128x8xi32> to vector<128x1xi32>
    %17 = vector.broadcast %16 : vector<128x1xi32> to vector<128x128xi32>
    %18 = arith.cmpi eq, %17, %7 : vector<128x128xi32>
    %19 = arith.extui %18 : vector<128x128xi1> to vector<128x128xi32>
    %20 = arith.sitofp %19 : vector<128x128xi32> to vector<128x128xf32>
    %21 = arith.truncf %20 : vector<128x128xf32> to vector<128x128xbf16>
    %22 = arith.addf %15, %21 : vector<128x128xbf16>
    %23 = vector.extract_strided_slice %3 {offsets = [0, 2], sizes = [128, 1], strides = [1, 1]} : vector<128x8xi32> to vector<128x1xi32>
    %24 = vector.broadcast %23 : vector<128x1xi32> to vector<128x128xi32>
    %25 = arith.cmpi eq, %24, %7 : vector<128x128xi32>
    %26 = arith.extui %25 : vector<128x128xi1> to vector<128x128xi32>
    %27 = arith.sitofp %26 : vector<128x128xi32> to vector<128x128xf32>
    %28 = arith.truncf %27 : vector<128x128xf32> to vector<128x128xbf16>
    %29 = arith.addf %22, %28 : vector<128x128xbf16>
    %30 = vector.extract_strided_slice %3 {offsets = [0, 3], sizes = [128, 1], strides = [1, 1]} : vector<128x8xi32> to vector<128x1xi32>
    %31 = vector.broadcast %30 : vector<128x1xi32> to vector<128x128xi32>
    %32 = arith.cmpi eq, %31, %7 : vector<128x128xi32>
    %33 = arith.extui %32 : vector<128x128xi1> to vector<128x128xi32>
    %34 = arith.sitofp %33 : vector<128x128xi32> to vector<128x128xf32>
    %35 = arith.truncf %34 : vector<128x128xf32> to vector<128x128xbf16>
    %36 = arith.addf %29, %35 : vector<128x128xbf16>
    %37 = vector.extract_strided_slice %3 {offsets = [0, 4], sizes = [128, 1], strides = [1, 1]} : vector<128x8xi32> to vector<128x1xi32>
    %38 = vector.broadcast %37 : vector<128x1xi32> to vector<128x128xi32>
    %39 = arith.cmpi eq, %38, %7 : vector<128x128xi32>
    %40 = arith.extui %39 : vector<128x128xi1> to vector<128x128xi32>
    %41 = arith.sitofp %40 : vector<128x128xi32> to vector<128x128xf32>
    %42 = arith.truncf %41 : vector<128x128xf32> to vector<128x128xbf16>
    %43 = arith.addf %36, %42 : vector<128x128xbf16>
    %44 = vector.extract_strided_slice %3 {offsets = [0, 5], sizes = [128, 1], strides = [1, 1]} : vector<128x8xi32> to vector<128x1xi32>
    %45 = vector.broadcast %44 : vector<128x1xi32> to vector<128x128xi32>
    %46 = arith.cmpi eq, %45, %7 : vector<128x128xi32>
    %47 = arith.extui %46 : vector<128x128xi1> to vector<128x128xi32>
    %48 = arith.sitofp %47 : vector<128x128xi32> to vector<128x128xf32>
    %49 = arith.truncf %48 : vector<128x128xf32> to vector<128x128xbf16>
    %50 = arith.addf %43, %49 : vector<128x128xbf16>
    %51 = vector.extract_strided_slice %3 {offsets = [0, 6], sizes = [128, 1], strides = [1, 1]} : vector<128x8xi32> to vector<128x1xi32>
    %52 = vector.broadcast %51 : vector<128x1xi32> to vector<128x128xi32>
    %53 = arith.cmpi eq, %52, %7 : vector<128x128xi32>
    %54 = arith.extui %53 : vector<128x128xi1> to vector<128x128xi32>
    %55 = arith.sitofp %54 : vector<128x128xi32> to vector<128x128xf32>
    %56 = arith.truncf %55 : vector<128x128xf32> to vector<128x128xbf16>
    %57 = arith.addf %50, %56 : vector<128x128xbf16>
    %58 = vector.extract_strided_slice %3 {offsets = [0, 7], sizes = [128, 1], strides = [1, 1]} : vector<128x8xi32> to vector<128x1xi32>
    %59 = vector.broadcast %58 : vector<128x1xi32> to vector<128x128xi32>
    %60 = arith.cmpi eq, %59, %7 : vector<128x128xi32>
    %61 = arith.extui %60 : vector<128x128xi1> to vector<128x128xi32>
    %62 = arith.sitofp %61 : vector<128x128xi32> to vector<128x128xf32>
    %63 = arith.truncf %62 : vector<128x128xf32> to vector<128x128xbf16>
    %64 = arith.addf %57, %63 : vector<128x128xbf16>
    %c0_2 = arith.constant 0 : index
    %c0_3 = arith.constant 0 : index
    %65 = vector.load %arg6[%c0_2, %c0_3] : memref<128x128xf32, #tpu.memory_space<vmem>>, vector<128x128xf32>
    %c0_4 = arith.constant 0 : index
    %c0_5 = arith.constant 0 : index
    %66 = vector.load %arg4[%c0_4, %c0_5] : memref<128x128xbf16, #tpu.memory_space<vmem>>, vector<128x128xbf16>
    %cst_6 = arith.constant dense<0.000000e+00> : vector<128x128xf32>
    %67 = tpu.matmul %64, %66, %cst_6 {dimension_numbers = #tpu.dot_dimension_numbers<[1], [0], [0], [1], [0, 0, 1, 1], [], []>} : vector<128x128xbf16>, vector<128x128xbf16>, vector<128x128xf32> -> vector<128x128xf32>
    %68 = arith.addf %65, %67 : vector<128x128xf32>
    %c0_7 = arith.constant 0 : index
    %c0_8 = arith.constant 0 : index
    %69 = vector.load %arg6[%c0_7, %c0_8] : memref<128x128xf32, #tpu.memory_space<vmem>>, vector<128x128xf32>
    tpu.vector_store %arg6[%c0_7, %c0_8], %68 {strides = array<i32>} : memref<128x128xf32, #tpu.memory_space<vmem>>, vector<128x128xf32>,
    %c1_i32 = arith.constant 1 : i32
    %70 = arith.cmpi eq, %arg1, %c1_i32 : i32
    %71 = arith.extui %70 : i1 to i32
    %c0_i32_9 = arith.constant 0 : i32
    %72 = arith.cmpi ne, %71, %c0_i32_9 : i32
    scf.if %72 {
      %c0_10 = arith.constant 0 : index
      %c0_11 = arith.constant 0 : index
      %73 = vector.load %arg3[%c0_10, %c0_11] : memref<128x1xf32, #tpu.memory_space<vmem>>, vector<128x1xf32>
      %cst_12 = arith.constant 1.000000e+00 : f32
      %74 = vector.broadcast %cst_12 : f32 to vector<128x1xf32>
      %75 = arith.maximumf %73, %74 : vector<128x1xf32>
      %c0_13 = arith.constant 0 : index
      %c0_14 = arith.constant 0 : index
      %76 = vector.load %arg6[%c0_13, %c0_14] : memref<128x128xf32, #tpu.memory_space<vmem>>, vector<128x128xf32>
      %77 = tpu.reciprocal %75 {approx = true} : vector<128x1xf32> -> vector<128x1xf32>
      %78 = vector.broadcast %77 : vector<128x1xf32> to vector<128x128xf32>
      %79 = arith.mulf %76, %78 : vector<128x128xf32>
      %c0_15 = arith.constant 0 : index
      %c0_16 = arith.constant 0 : index
      %80 = vector.load %arg5[%c0_15, %c0_16] : memref<128x128xf32, #tpu.memory_space<vmem>>, vector<128x128xf32>
      tpu.vector_store %arg5[%c0_15, %c0_16], %79 {strides = array<i32>} : memref<128x128xf32, #tpu.memory_space<vmem>>, vector<128x128xf32>,
    } else {
    }
    return
  }
  func.func @transform_0(%arg0: i32, %arg1: i32) -> (i32, i32) {
    %c0_i32 = arith.constant 0 : i32
    %c0_i32_0 = arith.constant 0 : i32
    return %arg0, %c0_i32 : i32, i32
  }
  func.func @transform_1(%arg0: i32, %arg1: i32) -> (i32, i32) {
    %c0_i32 = arith.constant 0 : i32
    %c0_i32_0 = arith.constant 0 : i32
    return %arg0, %c0_i32 : i32, i32
  }
  func.func @transform_2(%arg0: i32, %arg1: i32) -> (i32, i32) {
    %c0_i32 = arith.constant 0 : i32
    %c0_i32_0 = arith.constant 0 : i32
    return %arg1, %c0_i32 : i32, i32
  }
  func.func @transform_3(%arg0: i32, %arg1: i32) -> (i32, i32) {
    %c0_i32 = arith.constant 0 : i32
    %c0_i32_0 = arith.constant 0 : i32
    return %arg0, %c0_i32 : i32, i32
  }
}

</mosaic_0001>

<bundles_post_ra>
// kernel: tpu_custom_call.1
= control target key start
LH: loop header
LB: loop body
LE: loop exit
PB: predicated region body
PF: predicated region fallthrough
CT: control target
= control target key end

     0   :  { %8 = vsyncpa [#allocation4], 0  ;;  %s3105_s0 = inlined_call_operand.vmem [shape: s32[256,8], index: 0, kind: input, shape index: {}]   ;;  %s3106_s1 = inlined_call_operand.vmem [shape: f32[256,1], index: 1, kind: input, shape index: {}]   ;;  %s3107_s2 = inlined_call_operand.vmem [shape: bf16[256,128], index: 2, kind: input, shape index: {}]   ;;  %s3108_s3 = inlined_call_operand.hbm [shape: f32[256,128], index: 3, kind: output, shape index: {}]  }
   0x1   :  { %10 = vsyncpa [#allocation4 + $0x1], 0  ;;  %s2166_s12 = smov 0   ;;  %s2168_s13 = smov 0  }
   0x2   :  { %s2170_s14 = smov 0   ;;  %s2172_s15 = smov 0  }
   0x3   :  { %s2174_s16 = smov 0   ;;  %s2176_s17 = smov 0  }
   0x4   :  { %s2178_s18 = smov 0   ;;  %s2180_s19 = smov 0  }
   0x5 LB: > { %s1666_s20 = sadd.s32 4294967295, %s2130_s19   ;;  %s1667_s21 = sadd.s32 4294967294, %s2130_s19   ;;  %s2130_s19 = sphi %s2180_s19, %s16_s19   ;;  %s2126_s18 = sphi %s2178_s18, %s3122_s18   ;;  %s2122_s17 = sphi %s2176_s17, %s3121_s17   ;;  %s2118_s16 = sphi %s2174_s16, %s3120_s16   ;;  %s2114_s15 = sphi %s2172_s15, %s3119_s15   ;;  %s2110_s14 = sphi %s2170_s14, %s3118_s14   ;;  %s2106_s13 = sphi %s2168_s13, %s3117_s13   ;;  %s2102_s12 = sphi %s2166_s12, %s3116_s12  }
   0x6   : > { %s25_s22 = sadd.s32 1, %s2122_s17  ;;  %s28_s23 = sadd.s32 1, %s2126_s18 }
   0x7   : > { %p26_p0 = scmp.ge.s32.totalorder %s25_s22, 2  ;;  %p123_p1 = scmp.ne.s32.totalorder %s2110_s14, %s2106_s13 }
   0x8   : > { %p124_p2 = scmp.eq.s32.totalorder %s1666_s20, 3  ;;  %p129_p4 = scmp.ne.s32.totalorder %s2106_s13, %s2102_s12 }
   0x9   : > { %s3124_s22 = smov (%p26_p0, %s25_s22), 0  ;;  %s3126_s23 = smov (!%p26_p0, %s28_s23), %s2126_s18 }
   0xa   : > { %p2215_p3 = por %p124_p2, %p123_p1  ;;  %p30_p5 = scmp.ge.s32.totalorder %s3126_s23, 2 }
   0xb   : > { %p130_p6 = scmp.eq.s32.totalorder %s1667_s21, 3  ;;  %p1670_p7 = scmp.ge.s32.totalorder %s2130_s19, 1 }
   0xc   : > { %p175_p8 = scmp.lt.s32.totalorder %s2130_s19, 5  ;;  %s3128_s23 = smov (%p30_p5, %s3126_s23), 0 }
   0xd   : > { %3112 = sst [smem:[#allocation6_spill]] %s3128_s23  ;;  %p2225_p9 = por %p130_p6, %p129_p4 }
   0xe   : > { %p176_p10 = pnand %p1670_p7, %p175_p8  ;;  %s110_s26 = ssub.s32 %s2126_s18, %s3128_s23 }
   0xf   : > { %s113_s27 = sadd.s32 1, %s2110_s14  ;;  %p111_p11 = scmp.eq.s32.totalorder %s110_s26, 0 }
  0x10   : > { %179 = sbr.rel (%p176_p10) target bundleno = 843 (0x34b), region = 32  ;;  %s3109_s29 = sand.u32 (!%p176_p10), 1, %s2106_s13  }
  0x11   : > { %s2233_s28 = scalar_select %p111_p11, %s2110_s14, %s113_s27  }
  0x12   : > { %s1672_s30 = sshll.u32 (!%p176_p10), %s2118_s16, 4  ;;  %s1671_s4 = sshll.u32 (!%p176_p10), %s3109_s29, 7 }
  0x13   : > { %p210_p12 = scmp.lt.s32.totalorder (!%p176_p10), %s1672_s30, 31  ;;  %s1676_s5 = sshll.u32 (!%p176_p10), %s2114_s15, 4 }
  0x14   : > { %p222_p13 = scmp.lt.s32.totalorder (!%p176_p10), %s1676_s5, 31  ;;  %s2255_s23 = scalar_lea.vmem (!%p176_p10), [#allocation3], %s1671_s4 }
  0x15   : > { %p1678_p0 = scmp.ne.s32.totalorder (!%p176_p10), %s2114_s15, 0 }
  0x17   : > { %s3130_s30 = smov (!%p210_p12, %s1672_s30), 31  ;;  %s3132_s5 = smov (!%p222_p13, %s1676_s5), 31 }
  0x18   : > { %s1673_s6 = sshll.u32 %s3130_s30, 3  ;;  %s1677_s21 = sshll.u32 %s3132_s5, 2  ;;  %v2132_v0 = vmov (!%p1678_p0), 0.0  }
  0x19   : > { %s2243_s9 = scalar_lea.vmem %s3105_s0, %s1673_s6  ;;  %s2248_s20 = scalar_lea.vmem %s3106_s1, %s1673_s6  ;;  %233 = vst [vmem:[#allocation2] sm:$0xff] (!%p1678_p0), %v2132_v0  ;;  %234 = vst [vmem:[#allocation2 + $0x8] sm:$0xff] (!%p1678_p0), %v2132_v0 }
  0x1a   : > { %s2253_s29 = scalar_lea.vmem %s3107_s2, %s1677_s21  ;;  %232 = sbr.rel (%p1678_p0) target bundleno = 33 (0x21), region = 36  ;;  %235 = vst [vmem:[#allocation2 + $0x10] sm:$0xff] (!%p1678_p0), %v2132_v0  ;;  %236 = vst [vmem:[#allocation2 + $0x18] sm:$0xff] (!%p1678_p0), %v2132_v0 }
  0x1b   : > { %237 = vst [vmem:[#allocation2 + $0x20] sm:$0xff] (!%p1678_p0), %v2132_v0  ;;  %238 = vst [vmem:[#allocation2 + $0x28] sm:$0xff] (!%p1678_p0), %v2132_v0 }
  0x1c   : > { %239 = vst [vmem:[#allocation2 + $0x30] sm:$0xff] (!%p1678_p0), %v2132_v0  ;;  %240 = vst [vmem:[#allocation2 + $0x38] sm:$0xff] (!%p1678_p0), %v2132_v0 }
  0x1d   : > { %241 = vst [vmem:[#allocation2 + $0x40] sm:$0xff] (!%p1678_p0), %v2132_v0  ;;  %242 = vst [vmem:[#allocation2 + $0x48] sm:$0xff] (!%p1678_p0), %v2132_v0 }
  0x1e   : > { %243 = vst [vmem:[#allocation2 + $0x50] sm:$0xff] (!%p1678_p0), %v2132_v0  ;;  %244 = vst [vmem:[#allocation2 + $0x58] sm:$0xff] (!%p1678_p0), %v2132_v0 }
  0x1f   : > { %245 = vst [vmem:[#allocation2 + $0x60] sm:$0xff] (!%p1678_p0), %v2132_v0  ;;  %246 = vst [vmem:[#allocation2 + $0x68] sm:$0xff] (!%p1678_p0), %v2132_v0 }
  0x20   : > { %247 = vst [vmem:[#allocation2 + $0x70] sm:$0xff] (!%p1678_p0), %v2132_v0  ;;  %248 = vst [vmem:[#allocation2 + $0x78] sm:$0xff] (!%p1678_p0), %v2132_v0 }
  0x21 PF: > { %v2259_v1 = vld [vmem:[%s2243_s9 + $0x10] sm:$0xff]  ;;  %v2262_v2 = vld [vmem:[%s2243_s9] sm:$0xff]  ;;  %v2133_v3 = vmov 0   ;;  %v2267_v4 = vld [vmem:[%s2243_s9 + $0x18] sm:$0xff]  ;;  %v2134_v18 = vmov 1   ;;  %v2135_v19 = vmov 2   ;;  %v266_v46 = vlaneseq }
  0x22   : > { %1972 = vset.pattern.permute.xlu1 %v2133_v3  ;;  %1971 = vset.pattern.permute.xlu0 %v2133_v3  ;;  %v2270_v5 = vld [vmem:[%s2243_s9 + $0x8] sm:$0xff]  ;;  %v2276_v7 = vld [vmem:[%s2243_s9 + $0x20] sm:$0xff]  ;;  %v2283_v8 = vld [vmem:[%s2243_s9 + $0x38] sm:$0xff]  ;;  %v2136_v20 = vmov 3   ;;  %v2137_v21 = vmov 4   ;;  %v2138_v30 = vmov 5  }
  0x23   : > { %277 = vperm.xlu1 %1972, %v2259_v1   ;;  %271 = vperm.xlu0 %1971, %v2262_v2   ;;  %v2273_v6 = vld [vmem:[%s2243_s9 + $0x28] sm:$0xff]  ;;  %v2286_v9 = vld [vmem:[%s2243_s9 + $0x30] sm:$0xff]  ;;  %v2294_v11 = vld [vmem:[%s2243_s9 + $0x40] sm:$0xff]  ;;  %v2139_v39 = vmov 6   ;;  %s1679_s30 = sshll.u32 %s2114_s15, 7  ;;  %v267_v49 = vand.u32 127, %v266_v46 }
  0x24   : > { %v2291_v10 = vld [vmem:[%s2243_s9 + $0x48] sm:$0xff]  ;;  %v2299_v12 = vld [vmem:[%s2243_s9 + $0x58] sm:$0xff]  ;;  %v2302_v13 = vld [vmem:[%s2243_s9 + $0x50] sm:$0xff]  ;;  %v268_v52 = vstv %s1679_s30  ;;  %v2140_v58 = vmov 0.0   ;;  %v2141_v61 = vmov 7   ;;  %p1816_p1 = scmp.ne.s32.totalorder %s2114_s15, 1 }
  0x25   : > { %v2307_v14 = vld [vmem:[%s2243_s9 + $0x68] sm:$0xff]  ;;  %v2310_v15 = vld [vmem:[%s2243_s9 + $0x60] sm:$0xff]  ;;  %v2315_v16 = vld [vmem:[%s2243_s9 + $0x78] sm:$0xff]  ;;  %v2451_v53 = vadd.s32 %v268_v52, %v267_v49 }
  0x26   : > { %v2318_v17 = vld [vmem:[%s2243_s9 + $0x70] sm:$0xff] }
  0x27   : > { %280 = vperm.xlu1 %1972, %v2267_v4   ;;  %274 = vperm.xlu0 %1971, %v2270_v5  }
  0x2b   : > { %286 = vperm.xlu1 %1972, %v2273_v6   ;;  %283 = vperm.xlu0 %1971, %v2276_v7  }
  0x2f   : > { %292 = vperm.xlu1 %1972, %v2283_v8   ;;  %289 = vperm.xlu0 %1971, %v2286_v9  }
  0x33   : > { %298 = vperm.xlu1 %1972, %v2291_v10   ;;  %295 = vperm.xlu0 %1971, %v2294_v11  }
  0x37   : > { %304 = vperm.xlu1 %1972, %v2299_v12   ;;  %301 = vperm.xlu0 %1971, %v2302_v13  }
  0x3b   : > { %310 = vperm.xlu1 %1972, %v2307_v14   ;;  %307 = vperm.xlu0 %1971, %v2310_v15  }
  0x3f   : > { %316 = vperm.xlu1 %1972, %v2315_v16   ;;  %313 = vperm.xlu0 %1971, %v2318_v17  }
  0x43   : > { %1974 = vset.pattern.permute.xlu1 %v2134_v18  ;;  %1973 = vset.pattern.permute.xlu0 %v2134_v18 }
  0x44   : > { %386 = vperm.xlu1 %1974, %v2270_v5   ;;  %383 = vperm.xlu0 %1973, %v2262_v2  }
  0x48   : > { %389 = vperm.xlu1 %1974, %v2259_v1   ;;  %392 = vperm.xlu0 %1973, %v2267_v4  }
  0x4c   : > { %395 = vperm.xlu1 %1974, %v2276_v7   ;;  %398 = vperm.xlu0 %1973, %v2273_v6  }
  0x50   : > { %401 = vperm.xlu1 %1974, %v2286_v9   ;;  %404 = vperm.xlu0 %1973, %v2283_v8  }
  0x54   : > { %407 = vperm.xlu1 %1974, %v2294_v11   ;;  %410 = vperm.xlu0 %1973, %v2291_v10  }
  0x58   : > { %413 = vperm.xlu1 %1974, %v2302_v13   ;;  %416 = vperm.xlu0 %1973, %v2299_v12  }
  0x5c   : > { %419 = vperm.xlu1 %1974, %v2310_v15   ;;  %422 = vperm.xlu0 %1973, %v2307_v14  }
  0x60   : > { %425 = vperm.xlu1 %1974, %v2318_v17   ;;  %428 = vperm.xlu0 %1973, %v2315_v16  }
  0x64   : > { %1975 = vset.pattern.permute.xlu1 %v2135_v19  ;;  %1976 = vset.pattern.permute.xlu0 %v2135_v19  ;;  %v1994_v19 = vld [vmem:[%s2253_s29] sm:$0xff]  }
  0x65   : > { %495 = vperm.xlu1 %1975, %v2262_v2   ;;  %498 = vperm.xlu0 %1976, %v2270_v5  }
  0x66   : > { %1871 = vmatprep.subr.bf16.mxu1 %v1994_v19  ;;  %1839 = vmatprep.subr.bf16.mxu0 %v1994_v19 }
  0x67   : > { %1879 = vmatpush3.bf16.msra.mxu1 %v1994_v19  ;;  %1840 = vmatpush3.bf16.msra.mxu0 %v1994_v19 }
  0x69   : > { %501 = vperm.xlu1 %1975, %v2259_v1   ;;  %507 = vperm.xlu0 %1976, %v2276_v7  }
  0x6d   : > { %504 = vperm.xlu1 %1975, %v2267_v4   ;;  %513 = vperm.xlu0 %1976, %v2286_v9  }
  0x71   : > { %510 = vperm.xlu1 %1975, %v2273_v6   ;;  %519 = vperm.xlu0 %1976, %v2294_v11  }
  0x75   : > { %516 = vperm.xlu1 %1975, %v2283_v8   ;;  %525 = vperm.xlu0 %1976, %v2302_v13  }
  0x79   : > { %522 = vperm.xlu1 %1975, %v2291_v10   ;;  %531 = vperm.xlu0 %1976, %v2310_v15  }
  0x7d   : > { %528 = vperm.xlu1 %1975, %v2299_v12   ;;  %537 = vperm.xlu0 %1976, %v2318_v17  }
  0x81   : > { %534 = vperm.xlu1 %1975, %v2307_v14   ;;  %1977 = vset.pattern.permute.xlu0 %v2136_v20 }
  0x82   : > { %607 = vperm.xlu0 %1977, %v2262_v2  }
  0x85   : > { %540 = vperm.xlu1 %1975, %v2315_v16  }
  0x86   : > { %616 = vperm.xlu0 %1977, %v2267_v4  }
  0x89   : > { %1978 = vset.pattern.permute.xlu1 %v2136_v20 }
  0x8a   : > { %610 = vperm.xlu1 %1978, %v2270_v5   ;;  %634 = vperm.xlu0 %1977, %v2291_v10  }
  0x8e   : > { %613 = vperm.xlu1 %1978, %v2259_v1   ;;  %640 = vperm.xlu0 %1977, %v2299_v12  }
  0x92   : > { %631 = vperm.xlu1 %1978, %v2294_v11   ;;  %619 = vperm.xlu0 %1977, %v2276_v7  }
  0x96   : > { %637 = vperm.xlu1 %1978, %v2302_v13   ;;  %646 = vperm.xlu0 %1977, %v2307_v14  }
  0x9a   : > { %1979 = vset.pattern.permute.xlu1 %v2137_v21  ;;  %625 = vperm.xlu0 %1977, %v2286_v9  }
  0x9b   : > { %719 = vperm.xlu1 %1979, %v2262_v2  }
  0x9e   : > { %652 = vperm.xlu0 %1977, %v2315_v16  }
  0x9f   : > { %743 = vperm.xlu1 %1979, %v2294_v11  }
  0xa2   : > { %v2371_v22 = vpop.permute.xlu1 %277  ;;  %1985 = vset.pattern.permute.xlu0 %v2137_v21  ;;  %v2374_v23 = vpop.permute.xlu0 %271 }
  0xa3   : > { %746 = vperm.xlu1 %1979, %v2291_v10   ;;  %722 = vperm.xlu0 %1985, %v2270_v5   ;;  %vm318_vm0 = vcmp.eq.s32.totalorder %v2374_v23, %v2451_v53 }
  0xa4   : > { %v1680_v59 = vsel %vm318_vm0, 1.0, %v2140_v58 }
  0xa6   : > { %v2378_v24 = vpop.permute.xlu1 %280  ;;  %v2380_v25 = vpop.permute.xlu0 %274 }
  0xa7   : > { %728 = vperm.xlu1 %1979, %v2267_v4   ;;  %725 = vperm.xlu0 %1985, %v2259_v1   ;;  %vm319_vm1 = vcmp.eq.s32.totalorder %v2380_v25, %v2451_v53 }
  0xa8   : > { %v1681_v60 = vsel %vm319_vm1, 1.0, %v2140_v58 }
  0xa9   : > { %v366_v62 = vpack.c.bf16 %v1681_v60, %v1680_v59 }
  0xaa   : > { %v2384_v26 = vpop.permute.xlu1 %286  ;;  %v2386_v27 = vpop.permute.xlu0 %283 }
  0xab   : > { %752 = vperm.xlu1 %1979, %v2299_v12   ;;  %749 = vperm.xlu0 %1985, %v2302_v13   ;;  %v374_v23 = vadd.bf16 0, %v366_v62  ;;  %vm323_vm4 = vcmp.eq.s32.totalorder %v2384_v26, %v2451_v53  ;;  %vm322_vm5 = vcmp.eq.s32.totalorder %v2386_v27, %v2451_v53 }
  0xac   : > { %v1685_v26 = vsel %vm323_vm4, 1.0, %v2140_v58  ;;  %v1684_v27 = vsel %vm322_vm5, 1.0, %v2140_v58 }
  0xad   : > { %v368_v62 = vpack.c.bf16 %v1685_v26, %v1684_v27  ;;  %v1998_v26 = vld [vmem:[%s2253_s29 + $0x20] sm:$0xff]  }
  0xae   : > { %v2390_v28 = vpop.permute.xlu1 %292  ;;  %v2392_v29 = vpop.permute.xlu0 %289 }
  0xaf   : > { %1980 = vset.pattern.permute.xlu1 %v2138_v30  ;;  %731 = vperm.xlu0 %1985, %v2276_v7   ;;  %vm325_vm8 = vcmp.eq.s32.totalorder %v2390_v28, %v2451_v53  ;;  %vm324_vm9 = vcmp.eq.s32.totalorder %v2392_v29, %v2451_v53  ;;  %v1996_v29 = vld [vmem:[%s2253_s29 + $0x10] sm:$0xff]  }
  0xb0   : > { %834 = vperm.xlu1 %1980, %v2270_v5  }
  0xb2   : > { %v2397_v31 = vpop.permute.xlu1 %298  ;;  %v2399_v32 = vpop.permute.xlu0 %295 }
  0xb3   : > { %758 = vperm.xlu0 %1985, %v2307_v14   ;;  %vm327_vm10 = vcmp.eq.s32.totalorder %v2397_v31, %v2451_v53  ;;  %vm326_vm11 = vcmp.eq.s32.totalorder %v2399_v32, %v2451_v53  ;;  %v1997_v31 = vld [vmem:[%s2253_s29 + $0x18] sm:$0xff]  }
  0xb4   : > { %855 = vperm.xlu1 %1980, %v2294_v11  }
  0xb6   : > { %v2403_v33 = vpop.permute.xlu1 %304  ;;  %v2405_v34 = vpop.permute.xlu0 %301 }
  0xb7   : > { %740 = vperm.xlu0 %1985, %v2283_v8   ;;  %vm329_vm1 = vcmp.eq.s32.totalorder %v2403_v33, %v2451_v53 }
  0xb8   : > { %837 = vperm.xlu1 %1980, %v2259_v1  }
  0xba   : > { %v2409_v35 = vpop.permute.xlu1 %310  ;;  %v2411_v36 = vpop.permute.xlu0 %307 }
  0xbb   : > { %764 = vperm.xlu0 %1985, %v2315_v16  }
  0xbc   : > { %861 = vperm.xlu1 %1980, %v2302_v13  }
  0xbe   : > { %v2415_v37 = vpop.permute.xlu1 %316  ;;  %v2417_v38 = vpop.permute.xlu0 %313 }
  0xbf   : > { %1988 = vset.pattern.permute.xlu0 %v2138_v30 }
  0xc0   : > { %1981 = vset.pattern.permute.xlu1 %v2139_v39  ;;  %831 = vperm.xlu0 %1988, %v2262_v2  }
  0xc1   : > { %943 = vperm.xlu1 %1981, %v2262_v2  }
  0xc3   : > { %v387_v40 = vpop.permute.xlu1 %386  ;;  %v384_v41 = vpop.permute.xlu0 %383 }
  0xc4   : > { %858 = vperm.xlu0 %1988, %v2291_v10   ;;  %vm431_vm2 = vcmp.eq.s32.totalorder %v387_v40, %v2451_v53  ;;  %vm430_vm3 = vcmp.eq.s32.totalorder %v384_v41, %v2451_v53  ;;  %v1995_v41 = vld [vmem:[%s2253_s29 + $0x8] sm:$0xff]  }
  0xc5   : > { %967 = vperm.xlu1 %1981, %v2294_v11   ;;  %v1697_v3 = vsel %vm431_vm2, 1.0, %v2140_v58  ;;  %v1696_v18 = vsel %vm430_vm3, 1.0, %v2140_v58  ;;  %1872 = vmatprep.subr.bf16.mxu1 %v1995_v41  ;;  %vm328_vm2 = vcmp.eq.s32.totalorder %v2405_v34, %v2451_v53 }
  0xc6   : > { %v478_v25 = vpack.c.bf16 %v1697_v3, %v1696_v18  ;;  %1841 = vmatprep.subr.bf16.mxu0 %v1995_v41  ;;  %1880 = vmatpush3.bf16.msra.mxu1 %v1995_v41  ;;  %v1687_v3 = vsel %vm325_vm8, 1.0, %v2140_v58  ;;  %v1686_v18 = vsel %vm324_vm9, 1.0, %v2140_v58  ;;  %vm330_vm8 = vcmp.eq.s32.totalorder %v2411_v36, %v2451_v53 }
  0xc7   : > { %v2425_v42 = vpop.permute.xlu1 %389  ;;  %v2427_v43 = vpop.permute.xlu0 %392  ;;  %1842 = vmatpush3.bf16.msra.mxu0 %v1995_v41  ;;  %1873 = vmatprep.subr.bf16.mxu1 %v1996_v29  ;;  %v369_v32 = vpack.c.bf16 %v1687_v3, %v1686_v18 }
  0xc8   : > { %840 = vperm.xlu0 %1988, %v2267_v4   ;;  %v486_v49 = vadd.bf16 %v478_v25, %v374_v23  ;;  %1843 = vmatprep.subr.bf16.mxu0 %v1996_v29  ;;  %v376_v25 = vadd.bf16 0, %v368_v62 }
  0xc9   : > { %970 = vperm.xlu1 %1981, %v2291_v10  }
  0xca   : > { %1881 = vmatpush3.bf16.msra.mxu1 %v1996_v29 }
  0xcb   : > { %v2431_v44 = vpop.permute.xlu1 %395  ;;  %v2433_v45 = vpop.permute.xlu0 %398  ;;  %1844 = vmatpush3.bf16.msra.mxu0 %v1996_v29  ;;  %1874 = vmatprep.subr.bf16.mxu1 %v1997_v31 }
  0xcc   : > { %864 = vperm.xlu0 %1988, %v2299_v12   ;;  %vm434_vm12 = vcmp.eq.s32.totalorder %v2431_v44, %v2451_v53  ;;  %vm435_vm13 = vcmp.eq.s32.totalorder %v2433_v45, %v2451_v53  ;;  %v2525_v44 = vsel %vm327_vm10, 1.0, %v2140_v58  ;;  %v2531_v45 = vsel %vm326_vm11, 1.0, %v2140_v58  ;;  %1845 = vmatprep.subr.bf16.mxu0 %v1997_v31 }
  0xcd   : > { %952 = vperm.xlu1 %1981, %v2267_v4   ;;  %v1700_v28 = vsel %vm434_vm12, 1.0, %v2140_v58  ;;  %v1701_v19 = vsel %vm435_vm13, 1.0, %v2140_v58 }
  0xce   : > { %1882 = vmatpush3.bf16.msra.mxu1 %v1997_v31 }
  0xcf   : > { %v2437_v47 = vpop.permute.xlu1 %401  ;;  %v2439_v48 = vpop.permute.xlu0 %404  ;;  %1846 = vmatpush3.bf16.msra.mxu0 %v1997_v31  ;;  %1875 = vmatprep.subr.bf16.mxu1 %v1998_v26 }
  0xd0   : > { %846 = vperm.xlu0 %1988, %v2273_v6   ;;  %vm436_vm14 = vcmp.eq.s32.totalorder %v2437_v47, %v2451_v53  ;;  %vm437_vm15 = vcmp.eq.s32.totalorder %v2439_v48, %v2451_v53  ;;  %v480_v47 = vpack.c.bf16 %v1701_v19, %v1700_v28  ;;  %1847 = vmatprep.subr.bf16.mxu0 %v1998_v26 }
  0xd1   : > { %976 = vperm.xlu1 %1981, %v2299_v12   ;;  %v1702_v48 = vsel %vm436_vm14, 1.0, %v2140_v58 }
  0xd2   : > { %v488_v27 = vadd.bf16 %v480_v47, %v376_v25  ;;  %1883 = vmatpush3.bf16.msra.mxu1 %v1998_v26 }
  0xd3   : > { %v2444_v50 = vpop.permute.xlu1 %407  ;;  %v2446_v51 = vpop.permute.xlu0 %410  ;;  %1848 = vmatpush3.bf16.msra.mxu0 %v1998_v26 }
  0xd4   : > { %849 = vperm.xlu0 %1988, %v2286_v9   ;;  %vm438_vm3 = vcmp.eq.s32.totalorder %v2444_v50, %v2451_v53  ;;  %vm439_vm4 = vcmp.eq.s32.totalorder %v2446_v51, %v2451_v53  ;;  %v1999_v51 = vld [vmem:[%s2253_s29 + $0x28] sm:$0xff]  }
  0xd5   : > { %1982 = vset.pattern.permute.xlu1 %v2136_v20  ;;  %v1704_v29 = vsel %vm438_vm3, 1.0, %v2140_v58  ;;  %v1705_v34 = vsel %vm439_vm4, 1.0, %v2140_v58  ;;  %1876 = vmatprep.subr.bf16.mxu1 %v1999_v51 }
  0xd6   : > { %622 = vperm.xlu1 %1982, %v2273_v6   ;;  %1849 = vmatprep.subr.bf16.mxu0 %v1999_v51 }
  0xd7   : > { %v2453_v54 = vpop.permute.xlu1 %413  ;;  %v2455_v55 = vpop.permute.xlu0 %416  ;;  %1884 = vmatpush3.bf16.msra.mxu1 %v1999_v51  ;;  %1850 = vmatpush3.bf16.msra.mxu0 %v1999_v51 }
  0xd8   : > { %873 = vperm.xlu0 %1988, %v2318_v17   ;;  %vm440_vm9 = vcmp.eq.s32.totalorder %v2453_v54, %v2451_v53  ;;  %vm441_vm10 = vcmp.eq.s32.totalorder %v2455_v55, %v2451_v53  ;;  %v2000_v55 = vld [vmem:[%s2253_s29 + $0x30] sm:$0xff]  }
  0xd9   : > { %v1706_v25 = vsel %vm440_vm9, 1.0, %v2140_v58  ;;  %1877 = vmatprep.subr.bf16.mxu1 %v2000_v55  ;;  %1851 = vmatprep.subr.bf16.mxu0 %v2000_v55  ;;  %vm320_vm9 = vcmp.eq.s32.totalorder %v2371_v22, %v2451_v53 }
  0xda   : > { %643 = vperm.xlu1 %1982, %v2310_v15  }
  0xdb   : > { %v2463_v56 = vpop.permute.xlu1 %419  ;;  %v2465_v57 = vpop.permute.xlu0 %422  ;;  %1885 = vmatpush3.bf16.msra.mxu1 %v2000_v55  ;;  %1852 = vmatpush3.bf16.msra.mxu0 %v2000_v55 }
  0xdc   : > { %1990 = vset.pattern.permute.xlu0 %v2139_v39  ;;  %vm442_vm13 = vcmp.eq.s32.totalorder %v2463_v56, %v2451_v53  ;;  %vm443_vm14 = vcmp.eq.s32.totalorder %v2465_v57, %v2451_v53  ;;  %v2001_v57 = vld [vmem:[%s2253_s29 + $0x38] sm:$0xff]  }
  0xdd   : > { %946 = vperm.xlu0 %1990, %v2270_v5   ;;  %1878 = vmatprep.subr.bf16.mxu1 %v2001_v57 }
  0xde   : > { %1983 = vset.pattern.permute.xlu1 %v2141_v61  ;;  %1853 = vmatprep.subr.bf16.mxu0 %v2001_v57 }
  0xdf   : > { %v2474_v63 = vpop.permute.xlu1 %425  ;;  %1055 = vperm.xlu1 %1983, %v2262_v2   ;;  %v2477_v0 = vpop.permute.xlu0 %428  ;;  %1886 = vmatpush3.bf16.msra.mxu1 %v2001_v57 }
  0xe0   : > { %vm444_vm3 = vcmp.eq.s32.totalorder %v2474_v63, %v2451_v53  ;;  %vm445_vm4 = vcmp.eq.s32.totalorder %v2477_v0, %v2451_v53  ;;  %1854 = vmatpush3.bf16.msra.mxu0 %v2001_v57 }
  0xe1   : > { %949 = vperm.xlu0 %1990, %v2259_v1  }
  0xe3   : > { %1079 = vperm.xlu1 %1983, %v2294_v11  }
  0xe4   : > { %v496_v40 = vpop.permute.xlu1 %495  ;;  %v499_v2 = vpop.permute.xlu0 %498 }
  0xe5   : > { %vm542_vm6 = vcmp.eq.s32.totalorder %v496_v40, %v2451_v53  ;;  %vm543_vm7 = vcmp.eq.s32.totalorder %v499_v2, %v2451_v53  ;;  %973 = vperm.xlu0 %1990, %v2302_v13   ;;  %v370_v40 = vpack.c.bf16 %v2525_v44, %v2531_v45  ;;  %v1703_v2 = vsel %vm437_vm15, 1.0, %v2140_v58 }
  0xe6   : > { %v1712_v11 = vsel %vm542_vm6, 1.0, %v2140_v58  ;;  %v1713_v46 = vsel %vm543_vm7, 1.0, %v2140_v58  ;;  %vm331_vm7 = vcmp.eq.s32.totalorder %v2409_v35, %v2451_v53  ;;  %v377_v44 = vadd.bf16 0, %v369_v32 }
  0xe7   : > { %v590_v52 = vpack.c.bf16 %v1713_v46, %v1712_v11  ;;  %1082 = vperm.xlu1 %1983, %v2291_v10   ;;  %v2560_v46 = vsel %vm329_vm1, 1.0, %v2140_v58  ;;  %v1693_v19 = vsel %vm331_vm7, 1.0, %v2140_v58  ;;  %v482_v32 = vpack.c.bf16 %v1705_v34, %v1704_v29 }
  0xe8   : > { %v2505_v59 = vpop.permute.xlu1 %501  ;;  %v508_v60 = vpop.permute.xlu0 %507  ;;  %v1707_v35 = vsel %vm441_vm10, 1.0, %v2140_v58  ;;  %vm333_vm1 = vcmp.eq.s32.totalorder %v2415_v37, %v2451_v53  ;;  %v1710_v37 = vsel %vm444_vm3, 1.0, %v2140_v58  ;;  %vm321_vm10 = vcmp.eq.s32.totalorder %v2378_v24, %v2451_v53 }
  0xe9   : > { %v2511_v10 = vadd.bf16 %v590_v52, %v486_v49  ;;  %955 = vperm.xlu0 %1990, %v2276_v7   ;;  %vm546_vm0 = vcmp.eq.s32.totalorder %v508_v60, %v2451_v53  ;;  %v1690_v49 = vsel %vm328_vm2, 1.0, %v2140_v58  ;;  %v481_v60 = vpack.c.bf16 %v1703_v2, %v1702_v48 }
  0xea   : > { %v1716_v33 = vsel %vm546_vm0, 1.0, %v2140_v58  ;;  %v371_v28 = vpack.c.bf16 %v2560_v46, %v1690_v49  ;;  %v378_v2 = vadd.bf16 0, %v370_v40  ;;  %vm332_vm2 = vcmp.eq.s32.totalorder %v2417_v38, %v2451_v53 }
  0xeb   : > { %1984 = vset.pattern.permute.xlu1 %v2136_v20  ;;  %v483_v26 = vpack.c.bf16 %v1707_v35, %v1706_v25  ;;  %v1708_v49 = vsel %vm442_vm13, 1.0, %v2140_v58  ;;  %v1695_v29 = vsel %vm333_vm1, 1.0, %v2140_v58  ;;  %v1711_v38 = vsel %vm445_vm4, 1.0, %v2140_v58 }
  0xec   : > { %628 = vperm.xlu1 %1984, %v2283_v8   ;;  %v2536_v20 = vpop.permute.xlu1 %504  ;;  %v514_v23 = vpop.permute.xlu0 %513  ;;  %v490_v46 = vadd.bf16 %v482_v32, %v378_v2 }
  0xed   : > { %982 = vperm.xlu0 %1990, %v2307_v14   ;;  %vm548_vm5 = vcmp.eq.s32.totalorder %v514_v23, %v2451_v53  ;;  %v1692_v23 = vsel %vm330_vm8, 1.0, %v2140_v58 }
  0xee   : > { %v1718_v50 = vsel %vm548_vm5, 1.0, %v2140_v58 }
  0xf0   : > { %649 = vperm.xlu1 %1984, %v2318_v17   ;;  %v511_v41 = vpop.permute.xlu1 %510  ;;  %v520_v11 = vpop.permute.xlu0 %519 }
  0xf1   : > { %vm547_vm6 = vcmp.eq.s32.totalorder %v511_v41, %v2451_v53  ;;  %964 = vperm.xlu0 %1990, %v2283_v8   ;;  %vm550_vm11 = vcmp.eq.s32.totalorder %v520_v11, %v2451_v53  ;;  %v372_v41 = vpack.c.bf16 %v1693_v19, %v1692_v23  ;;  %v379_v11 = vadd.bf16 0, %v371_v28 }
  0xf2   : > { %v1717_v52 = vsel %vm547_vm6, 1.0, %v2140_v58  ;;  %v1720_v36 = vsel %vm550_vm11, 1.0, %v2140_v58  ;;  %v485_v23 = vpack.c.bf16 %v1711_v38, %v1710_v37  ;;  %vm432_vm11 = vcmp.eq.s32.totalorder %v2425_v42, %v2451_v53 }
  0xf3   : > { %v592_v62 = vpack.c.bf16 %v1717_v52, %v1716_v33  ;;  %v1709_v52 = vsel %vm443_vm14, 1.0, %v2140_v58  ;;  %v1682_v42 = vsel %vm320_vm9, 1.0, %v2140_v58  ;;  %vm545_vm14 = vcmp.eq.s32.totalorder %v2536_v20, %v2451_v53 }
  0xf4   : > { %1986 = vset.pattern.permute.xlu1 %v2141_v61  ;;  %v517_v3 = vpop.permute.xlu1 %516  ;;  %v526_v18 = vpop.permute.xlu0 %525  ;;  %v1698_v35 = vsel %vm432_vm11, 1.0, %v2140_v58  ;;  %v1715_v22 = vsel %vm545_vm14, 1.0, %v2140_v58 }
  0xf5   : > { %v2593_v45 = vadd.bf16 %v592_v62, %v488_v27  ;;  %vm549_vm12 = vcmp.eq.s32.totalorder %v517_v3, %v2451_v53  ;;  %1061 = vperm.xlu1 %1986, %v2259_v1   ;;  %988 = vperm.xlu0 %1990, %v2315_v16   ;;  %v489_v1 = vadd.bf16 %v481_v60, %v377_v44  ;;  %v1694_v62 = vsel %vm332_vm2, 1.0, %v2140_v58 }
  0xf6   : > { %v1719_v31 = vsel %vm549_vm12, 1.0, %v2140_v58  ;;  %vm552_vm15 = vcmp.eq.s32.totalorder %v526_v18, %v2451_v53  ;;  %v484_v3 = vpack.c.bf16 %v1709_v52, %v1708_v49  ;;  %v373_v51 = vpack.c.bf16 %v1695_v29, %v1694_v62 }
  0xf7   : > { %v593_v47 = vpack.c.bf16 %v1719_v31, %v1718_v50  ;;  %v491_v50 = vadd.bf16 %v483_v26, %v379_v11  ;;  %vm433_vm12 = vcmp.eq.s32.totalorder %v2427_v43, %v2451_v53 }
  0xf8   : > { %v523_v54 = vpop.permute.xlu1 %522  ;;  %v532_v48 = vpop.permute.xlu0 %531  ;;  %v381_v32 = vadd.bf16 0, %v373_v51 }
  0xf9   : > { %v2625_v33 = vadd.bf16 %v593_v47, %v489_v1  ;;  %vm551_vm0 = vcmp.eq.s32.totalorder %v523_v54, %v2451_v53  ;;  %1085 = vperm.xlu1 %1986, %v2302_v13   ;;  %1992 = vset.pattern.permute.xlu0 %v2141_v61  ;;  %vm554_vm5 = vcmp.eq.s32.totalorder %v532_v48, %v2451_v53  ;;  %v1683_v1 = vsel %vm321_vm10, 1.0, %v2140_v58 }
  0xfa   : > { %v1721_v40 = vsel %vm551_vm0, 1.0, %v2140_v58  ;;  %1058 = vperm.xlu0 %1992, %v2270_v5   ;;  %v1722_v5 = vsel %vm552_vm15, 1.0, %v2140_v58  ;;  %v493_v54 = vadd.bf16 %v485_v23, %v381_v32  ;;  %v367_v2 = vpack.c.bf16 %v1683_v1, %v1682_v42 }
  0xfb   : > { %v594_v13 = vpack.c.bf16 %v1721_v40, %v1720_v36  ;;  %v1699_v36 = vsel %vm433_vm12, 1.0, %v2140_v58  ;;  %vm544_vm0 = vcmp.eq.s32.totalorder %v2505_v59, %v2451_v53 }
  0xfc   : > { %v529_v27 = vpop.permute.xlu1 %528  ;;  %v538_v60 = vpop.permute.xlu0 %537  ;;  %v479_v11 = vpack.c.bf16 %v1699_v36, %v1698_v35  ;;  %v375_v26 = vadd.bf16 0, %v367_v2 }
  0xfd   : > { %v2653_v56 = vadd.bf16 %v594_v13, %v490_v46  ;;  %vm553_vm6 = vcmp.eq.s32.totalorder %v529_v27, %v2451_v53  ;;  %1088 = vperm.xlu1 %1986, %v2299_v12   ;;  %v380_v12 = vadd.bf16 0, %v372_v41  ;;  %vm556_vm7 = vcmp.eq.s32.totalorder %v538_v60, %v2451_v53 }
  0xfe   : > { %v1723_v34 = vsel %vm553_vm6, 1.0, %v2140_v58  ;;  %1064 = vperm.xlu0 %1992, %v2267_v4   ;;  %v1724_v4 = vsel %vm554_vm5, 1.0, %v2140_v58  ;;  %v1714_v46 = vsel %vm544_vm0, 1.0, %v2140_v58  ;;  %v487_v60 = vadd.bf16 %v479_v11, %v375_v26 }
  0xff   : > { %v595_v18 = vpack.c.bf16 %v1723_v34, %v1722_v5  ;;  %v492_v19 = vadd.bf16 %v484_v3, %v380_v12  ;;  %v591_v13 = vpack.c.bf16 %v1715_v22, %v1714_v46 }
 0x100   : > { %v535_v44 = vpop.permute.xlu1 %534 }
 0x101   : > { %v2680_v28 = vadd.bf16 %v595_v18, %v491_v50  ;;  %vm555_vm8 = vcmp.eq.s32.totalorder %v535_v44, %v2451_v53  ;;  %1987 = vset.pattern.permute.xlu1 %v2137_v21  ;;  %v608_v63 = vpop.permute.xlu0 %607  ;;  %v1726_v21 = vsel %vm556_vm7, 1.0, %v2140_v58  ;;  %v599_v62 = vadd.bf16 %v591_v13, %v487_v60 }
 0x102   : > { %v1725_v0 = vsel %vm555_vm8, 1.0, %v2140_v58  ;;  %734 = vperm.xlu1 %1987, %v2273_v6   ;;  %1070 = vperm.xlu0 %1992, %v2273_v6   ;;  %vm654_vm15 = vcmp.eq.s32.totalorder %v608_v63, %v2451_v53 }
 0x103   : > { %v596_v31 = vpack.c.bf16 %v1725_v0, %v1724_v4  ;;  %v1728_v20 = vsel %vm654_vm15, 1.0, %v2140_v58 }
 0x104   : > { %v541_v24 = vpop.permute.xlu1 %540 }
 0x105   : > { %v2700_v25 = vadd.bf16 %v596_v31, %v492_v19  ;;  %vm557_vm13 = vcmp.eq.s32.totalorder %v541_v24, %v2451_v53  ;;  %v617_v47 = vpop.permute.xlu0 %616 }
 0x106   : > { %v1727_v43 = vsel %vm557_vm13, 1.0, %v2140_v58  ;;  %755 = vperm.xlu1 %1987, %v2310_v15   ;;  %1073 = vperm.xlu0 %1992, %v2286_v9   ;;  %vm657_vm1 = vcmp.eq.s32.totalorder %v617_v47, %v2451_v53 }
 0x107   : > { %v597_v48 = vpack.c.bf16 %v1727_v43, %v1726_v21  ;;  %v1731_v52 = vsel %vm657_vm1, 1.0, %v2140_v58 }
 0x109   : > { %v2719_v55 = vadd.bf16 %v597_v48, %v493_v54  ;;  %v611_v41 = vpop.permute.xlu1 %610  ;;  %v635_v40 = vpop.permute.xlu0 %634 }
 0x10a   : > { %vm655_vm2 = vcmp.eq.s32.totalorder %v611_v41, %v2451_v53  ;;  %737 = vperm.xlu1 %1987, %v2286_v9   ;;  %1097 = vperm.xlu0 %1992, %v2318_v17   ;;  %vm663_vm3 = vcmp.eq.s32.totalorder %v635_v40, %v2451_v53 }
 0x10b   : > { %v1729_v59 = vsel %vm655_vm2, 1.0, %v2140_v58  ;;  %v1737_v50 = vsel %vm663_vm3, 1.0, %v2140_v58 }
 0x10c   : > { %v702_v49 = vpack.c.bf16 %v1729_v59, %v1728_v20 }
 0x10d   : > { %v614_v5 = vpop.permute.xlu1 %613  ;;  %v641_v27 = vpop.permute.xlu0 %640 }
 0x10e   : > { %v710_v57 = vadd.bf16 %v702_v49, %v2511_v10  ;;  %vm656_vm4 = vcmp.eq.s32.totalorder %v614_v5, %v2451_v53  ;;  %761 = vperm.xlu1 %1987, %v2318_v17   ;;  %vm665_vm5 = vcmp.eq.s32.totalorder %v641_v27, %v2451_v53 }
 0x10f   : > { %v1730_v29 = vsel %vm656_vm4, 1.0, %v2140_v58  ;;  %v1739_v38 = vsel %vm665_vm5, 1.0, %v2140_v58 }
 0x110   : > { %v703_v34 = vpack.c.bf16 %v1731_v52, %v1730_v29 }
 0x111   : > { %v632_v3 = vpop.permute.xlu1 %631  ;;  %v2734_v18 = vpop.permute.xlu0 %619 }
 0x112   : > { %v711_v12 = vadd.bf16 %v703_v34, %v599_v62  ;;  %vm662_vm6 = vcmp.eq.s32.totalorder %v632_v3, %v2451_v53  ;;  %1989 = vset.pattern.permute.xlu1 %v2138_v30  ;;  %vm658_vm0 = vcmp.eq.s32.totalorder %v2734_v18, %v2451_v53 }
 0x113   : > { %v1736_v10 = vsel %vm662_vm6, 1.0, %v2140_v58  ;;  %843 = vperm.xlu1 %1989, %v2276_v7  }
 0x114   : > { %v706_v37 = vpack.c.bf16 %v1737_v50, %v1736_v10 }
 0x115   : > { %v638_v4 = vpop.permute.xlu1 %637  ;;  %v2742_v44 = vpop.permute.xlu0 %646 }
 0x116   : > { %v2745_v51 = vadd.bf16 %v706_v37, %v2653_v56  ;;  %vm664_vm7 = vcmp.eq.s32.totalorder %v638_v4, %v2451_v53  ;;  %vm667_vm2 = vcmp.eq.s32.totalorder %v2742_v44, %v2451_v53 }
 0x117   : > { %v1738_v63 = vsel %vm664_vm7, 1.0, %v2140_v58  ;;  %867 = vperm.xlu1 %1989, %v2310_v15   ;;  %v1741_v18 = vsel %vm667_vm2, 1.0, %v2140_v58 }
 0x118   : > { %v707_v30 = vpack.c.bf16 %v1739_v38, %v1738_v63 }
 0x119   : > { %v2750_v0 = vpop.permute.xlu0 %625 }
 0x11a   : > { %v715_v19 = vadd.bf16 %v707_v30, %v2680_v28  ;;  %v720_v23 = vpop.permute.xlu1 %719 }
 0x11b   : > { %870 = vperm.xlu1 %1989, %v2307_v14   ;;  %vm766_vm8 = vcmp.eq.s32.totalorder %v720_v23, %v2451_v53 }
 0x11c   : > { %v1744_v28 = vsel %vm766_vm8, 1.0, %v2140_v58 }
 0x11d   : > { %v2754_v31 = vpop.permute.xlu0 %652 }
 0x11e   : > { %v2756_v21 = vpop.permute.xlu1 %743 }
 0x11f   : > { %852 = vperm.xlu1 %1989, %v2283_v8   ;;  %vm774_vm5 = vcmp.eq.s32.totalorder %v2756_v21, %v2451_v53 }
 0x122   : > { %v2760_v56 = vpop.permute.xlu1 %746  ;;  %v723_v24 = vpop.permute.xlu0 %722 }
 0x123   : > { %vm767_vm9 = vcmp.eq.s32.totalorder %v723_v24, %v2451_v53  ;;  %876 = vperm.xlu1 %1989, %v2315_v16   ;;  %vm775_vm4 = vcmp.eq.s32.totalorder %v2760_v56, %v2451_v53  ;;  %v1752_v56 = vsel %vm774_vm5, 1.0, %v2140_v58 }
 0x124   : > { %v1745_v1 = vsel %vm767_vm9, 1.0, %v2140_v58  ;;  %v1753_v44 = vsel %vm775_vm4, 1.0, %v2140_v58 }
 0x125   : > { %v814_v32 = vpack.c.bf16 %v1745_v1, %v1744_v28  ;;  %v818_v21 = vpack.c.bf16 %v1753_v44, %v1752_v56 }
 0x126   : > { %v729_v47 = vpop.permute.xlu1 %728  ;;  %v726_v42 = vpop.permute.xlu0 %725 }
 0x127   : > { %v822_v43 = vadd.bf16 %v814_v32, %v710_v57  ;;  %vm769_vm10 = vcmp.eq.s32.totalorder %v729_v47, %v2451_v53  ;;  %vm768_vm11 = vcmp.eq.s32.totalorder %v726_v42, %v2451_v53  ;;  %1991 = vset.pattern.permute.xlu1 %v2139_v39 }
 0x128   : > { %v1747_v35 = vsel %vm769_vm10, 1.0, %v2140_v58  ;;  %v1746_v36 = vsel %vm768_vm11, 1.0, %v2140_v58  ;;  %958 = vperm.xlu1 %1991, %v2273_v6  }
 0x129   : > { %v815_v54 = vpack.c.bf16 %v1747_v35, %v1746_v36  ;;  %v826_v35 = vadd.bf16 %v818_v21, %v2745_v51 }
 0x12a   : > { %v753_v48 = vpop.permute.xlu1 %752  ;;  %v750_v2 = vpop.permute.xlu0 %749 }
 0x12b   : > { %v2772_v22 = vadd.bf16 %v815_v54, %v711_v12  ;;  %vm777_vm12 = vcmp.eq.s32.totalorder %v753_v48, %v2451_v53  ;;  %vm776_vm13 = vcmp.eq.s32.totalorder %v750_v2, %v2451_v53 }
 0x12c   : > { %v1755_v20 = vsel %vm777_vm12, 1.0, %v2140_v58  ;;  %v1754_v41 = vsel %vm776_vm13, 1.0, %v2140_v58  ;;  %979 = vperm.xlu1 %1991, %v2310_v15   ;;  %vm660_vm12 = vcmp.eq.s32.totalorder %v2750_v0, %v2451_v53 }
 0x12d   : > { %v819_v39 = vpack.c.bf16 %v1755_v20, %v1754_v41 }
 0x12e   : > { %v2779_v40 = vpop.permute.xlu0 %731 }
 0x12f   : > { %v2781_v11 = vadd.bf16 %v819_v39, %v715_v19  ;;  %v835_v6 = vpop.permute.xlu1 %834 }
 0x130   : > { %961 = vperm.xlu1 %1991, %v2286_v9   ;;  %vm879_vm14 = vcmp.eq.s32.totalorder %v835_v6, %v2451_v53 }
 0x131   : > { %v1761_v5 = vsel %vm879_vm14, 1.0, %v2140_v58  ;;  %vm669_vm14 = vcmp.eq.s32.totalorder %v2754_v31, %v2451_v53 }
 0x132   : > { %v2784_v46 = vpop.permute.xlu0 %758 }
 0x133   : > { %v856_v59 = vpop.permute.xlu1 %855 }
 0x134   : > { %985 = vperm.xlu1 %1991, %v2318_v17   ;;  %vm886_vm7 = vcmp.eq.s32.totalorder %v856_v59, %v2451_v53 }
 0x135   : > { %v1768_v1 = vsel %vm886_vm7, 1.0, %v2140_v58 }
 0x136   : > { %v2787_v26 = vpop.permute.xlu0 %740 }
 0x137   : > { %v2789_v13 = vpop.permute.xlu1 %837 }
 0x138   : > { %1993 = vset.pattern.permute.xlu1 %v2141_v61 }
 0x139   : > { %1067 = vperm.xlu1 %1993, %v2276_v7  }
 0x13a   : > { %v2793_v49 = vpop.permute.xlu0 %764 }
 0x13b   : > { %v2795_v52 = vpop.permute.xlu1 %861 }
 0x13c   : > { %vm888_vm5 = vcmp.eq.s32.totalorder %v2795_v52, %v2451_v53 }
 0x13d   : > { %1091 = vperm.xlu1 %1993, %v2310_v15   ;;  %v1770_v52 = vsel %vm888_vm5, 1.0, %v2140_v58 }
 0x13f   : > { %v832_v9 = vpop.permute.xlu0 %831 }
 0x140   : > { %vm878_vm15 = vcmp.eq.s32.totalorder %v832_v9, %v2451_v53  ;;  %v2800_v17 = vpop.permute.xlu1 %943 }
 0x141   : > { %v1760_v27 = vsel %vm878_vm15, 1.0, %v2140_v58  ;;  %1094 = vperm.xlu1 %1993, %v2307_v14   ;;  %vm990_vm4 = vcmp.eq.s32.totalorder %v2800_v17, %v2451_v53 }
 0x142   : > { %v926_v7 = vpack.c.bf16 %v1761_v5, %v1760_v27  ;;  %v1734_v5 = vsel %vm660_vm12, 1.0, %v2140_v58  ;;  %v1776_v17 = vsel %vm990_vm4, 1.0, %v2140_v58  ;;  %vm773_vm4 = vcmp.eq.s32.totalorder %v2787_v26, %v2451_v53 }
 0x143   : > { %v859_v61 = vpop.permute.xlu0 %858 }
 0x144   : > { %v968_v60 = vpop.permute.xlu1 %967  ;;  %v2805_v57 = vadd.bf16 %v926_v7, %v822_v43  ;;  %vm887_vm6 = vcmp.eq.s32.totalorder %v859_v61, %v2451_v53 }
 0x145   : > { %1076 = vperm.xlu1 %1993, %v2283_v8   ;;  %v1732_v8 = vsel %vm658_vm0, 1.0, %v2140_v58  ;;  %v1769_v24 = vsel %vm887_vm6, 1.0, %v2140_v58  ;;  %vm998_vm9 = vcmp.eq.s32.totalorder %v968_v60, %v2451_v53 }
 0x146   : > { %v930_v47 = vpack.c.bf16 %v1769_v24, %v1768_v1  ;;  %v1784_v42 = vsel %vm998_vm9, 1.0, %v2140_v58 }
 0x147   : > { %v2808_v15 = vpop.permute.xlu0 %840 }
 0x148   : > { %v971_v29 = vpop.permute.xlu1 %970  ;;  %v938_v48 = vadd.bf16 %v930_v47, %v826_v35 }
 0x149   : > { %1100 = vperm.xlu1 %1993, %v2315_v16   ;;  %vm999_vm8 = vcmp.eq.s32.totalorder %v971_v29, %v2451_v53  ;;  %v1743_v29 = vsel %vm669_vm14, 1.0, %v2140_v58 }
 0x14b   : > { %v2811_v62 = vpop.permute.xlu0 %864 }
 0x14c   : > { %v2813_v34 = vpop.permute.xlu1 %952  ;;  %vm889_vm2 = vcmp.eq.s32.totalorder %v2811_v62, %v2451_v53 }
 0x14f   : > { %v2815_v50 = vpop.permute.xlu0 %846 }
 0x150   : > { %v2817_v3 = vpop.permute.xlu1 %976 }
 0x151   : > { %vm1001_vm9 = vcmp.eq.s32.totalorder %v2817_v3, %v2451_v53 }
 0x153   : > { %v2819_v14 = vpop.permute.xlu0 %849 }
 0x155   : > { %v623_v12 = vpop.permute.xlu1 %622 }
 0x156   : > { %vm659_vm1 = vcmp.eq.s32.totalorder %v623_v12, %v2451_v53 }
 0x157   : > { %v1733_v16 = vsel %vm659_vm1, 1.0, %v2140_v58  ;;  %v2826_v10 = vpop.permute.xlu0 %873  ;;  %vm881_vm1 = vcmp.eq.s32.totalorder %v2808_v15, %v2451_v53 }
 0x158   : > { %v704_v37 = vpack.c.bf16 %v1733_v16, %v1732_v8  ;;  %v1763_v62 = vsel %vm881_vm1, 1.0, %v2140_v58 }
 0x159   : > { %v644_v38 = vpop.permute.xlu1 %643 }
 0x15a   : > { %v2831_v4 = vadd.bf16 %v704_v37, %v2593_v45  ;;  %vm666_vm3 = vcmp.eq.s32.totalorder %v644_v38, %v2451_v53 }
 0x15b   : > { %v1740_v63 = vsel %vm666_vm3, 1.0, %v2140_v58  ;;  %vm880_vm3 = vcmp.eq.s32.totalorder %v2789_v13, %v2451_v53  ;;  %v1771_v13 = vsel %vm889_vm2, 1.0, %v2140_v58  ;;  %vm779_vm2 = vcmp.eq.s32.totalorder %v2784_v46, %v2451_v53 }
 0x15c   : > { %v708_v30 = vpack.c.bf16 %v1741_v18, %v1740_v63  ;;  %v947_v19 = vpop.permute.xlu0 %946  ;;  %v1751_v46 = vsel %vm773_vm4, 1.0, %v2140_v58 }
 0x15d   : > { %vm991_vm0 = vcmp.eq.s32.totalorder %v947_v19, %v2451_v53 }
 0x15e   : > { %v2843_v45 = vadd.bf16 %v708_v30, %v2700_v25  ;;  %v2845_v23 = vpop.permute.xlu1 %1055  ;;  %v1785_v25 = vsel %vm999_vm8, 1.0, %v2140_v58  ;;  %v1777_v15 = vsel %vm991_vm0, 1.0, %v2140_v58  ;;  %vm993_vm8 = vcmp.eq.s32.totalorder %v2813_v34, %v2451_v53 }
 0x15f   : > { %v1042_v36 = vpack.c.bf16 %v1785_v25, %v1784_v42  ;;  %v1038_v37 = vpack.c.bf16 %v1777_v15, %v1776_v17  ;;  %v931_v30 = vpack.c.bf16 %v1771_v13, %v1770_v52  ;;  %v1779_v56 = vsel %vm993_vm8, 1.0, %v2140_v58 }
 0x160   : > { %v2851_v28 = vpop.permute.xlu0 %949  ;;  %v1787_v34 = vsel %vm1001_vm9, 1.0, %v2140_v58  ;;  %vm770_vm0 = vcmp.eq.s32.totalorder %v2779_v40, %v2451_v53  ;;  %vm883_vm8 = vcmp.eq.s32.totalorder %v2815_v50, %v2451_v53 }
 0x161   : > { %v1050_v39 = vadd.bf16 %v1042_v36, %v938_v48  ;;  %vm992_vm7 = vcmp.eq.s32.totalorder %v2851_v28, %v2451_v53  ;;  %v1046_v1 = vadd.bf16 %v1038_v37, %v2805_v57  ;;  %v939_v47 = vadd.bf16 %v931_v30, %v2781_v11 }
 0x162   : > { %v1080_v32 = vpop.permute.xlu1 %1079  ;;  %v1778_v19 = vsel %vm992_vm7, 1.0, %v2140_v58 }
 0x163   : > { %vm1110_vm10 = vcmp.eq.s32.totalorder %v1080_v32, %v2451_v53  ;;  %v1039_v28 = vpack.c.bf16 %v1779_v56, %v1778_v19 }
 0x164   : > { %v974_v43 = vpop.permute.xlu0 %973  ;;  %v1800_v2 = vsel %vm1110_vm10, 1.0, %v2140_v58  ;;  %vm1102_vm10 = vcmp.eq.s32.totalorder %v2845_v23, %v2451_v53 }
 0x165   : > { %vm1000_vm6 = vcmp.eq.s32.totalorder %v974_v43, %v2451_v53  ;;  %v1792_v3 = vsel %vm1102_vm10, 1.0, %v2140_v58  ;;  %vm884_vm10 = vcmp.eq.s32.totalorder %v2819_v14, %v2451_v53 }
 0x166   : > { %v1083_v54 = vpop.permute.xlu1 %1082  ;;  %v1786_v38 = vsel %vm1000_vm6, 1.0, %v2140_v58  ;;  %vm781_vm6 = vcmp.eq.s32.totalorder %v2793_v49, %v2451_v53  ;;  %v1765_v49 = vsel %vm883_vm8, 1.0, %v2140_v58  ;;  %v1766_v50 = vsel %vm884_vm10, 1.0, %v2140_v58 }
 0x167   : > { %vm1111_vm11 = vcmp.eq.s32.totalorder %v1083_v54, %v2451_v53  ;;  %v1043_v24 = vpack.c.bf16 %v1787_v34, %v1786_v38  ;;  %v1759_v26 = vsel %vm781_vm6, 1.0, %v2140_v58 }
 0x168   : > { %v1801_v20 = vsel %vm1111_vm11, 1.0, %v2140_v58  ;;  %v2862_v41 = vpop.permute.xlu0 %955 }
 0x169   : > { %v1154_v6 = vpack.c.bf16 %v1801_v20, %v1800_v2  ;;  %v1051_v54 = vadd.bf16 %v1043_v24, %v939_v47 }
 0x16b   : > { %v629_v59 = vpop.permute.xlu1 %628  ;;  %v1162_v51 = vadd.bf16 %v1154_v6, %v1050_v39 }
 0x16c   : > { %vm661_vm13 = vcmp.eq.s32.totalorder %v629_v59, %v2451_v53  ;;  %v2867_v9 = vpop.permute.xlu0 %982  ;;  %v1748_v59 = vsel %vm770_vm0, 1.0, %v2140_v58 }
 0x16d   : > { %v1735_v27 = vsel %vm661_vm13, 1.0, %v2140_v58  ;;  %1863 = vmatprep.mubr.bf16.mxu1 %v1162_v51 }
 0x16e   : > { %v705_v7 = vpack.c.bf16 %v1735_v27, %v1734_v5 }
 0x16f   : > { %v650_v61 = vpop.permute.xlu1 %649 }
 0x170   : > { %v2874_v60 = vadd.bf16 %v705_v7, %v2625_v33  ;;  %vm668_vm15 = vcmp.eq.s32.totalorder %v650_v61, %v2451_v53  ;;  %v2877_v0 = vpop.permute.xlu0 %964  ;;  %v1757_v7 = vsel %vm779_vm2, 1.0, %v2140_v58  ;;  %vm1003_vm2 = vcmp.eq.s32.totalorder %v2867_v9, %v2451_v53 }
 0x171   : > { %v1742_v12 = vsel %vm668_vm15, 1.0, %v2140_v58  ;;  %v1789_v47 = vsel %vm1003_vm2, 1.0, %v2140_v58  ;;  %vm997_vm4 = vcmp.eq.s32.totalorder %v2877_v0, %v2451_v53 }
 0x172   : > { %v709_v8 = vpack.c.bf16 %v1743_v29, %v1742_v12  ;;  %v1783_v9 = vsel %vm997_vm4, 1.0, %v2140_v58 }
 0x174   : > { %v2891_v33 = vadd.bf16 %v709_v8, %v2719_v55  ;;  %v1062_v31 = vpop.permute.xlu1 %1061  ;;  %v2893_v16 = vpop.permute.xlu0 %988  ;;  %v1762_v55 = vsel %vm880_vm3, 1.0, %v2140_v58 }
 0x175   : > { %v927_v63 = vpack.c.bf16 %v1763_v62, %v1762_v55  ;;  %vm1104_vm13 = vcmp.eq.s32.totalorder %v1062_v31, %v2451_v53  ;;  %vm1005_vm6 = vcmp.eq.s32.totalorder %v2893_v16, %v2451_v53 }
 0x176   : > { %v1794_v48 = vsel %vm1104_vm13, 1.0, %v2140_v58  ;;  %v1791_v0 = vsel %vm1005_vm6, 1.0, %v2140_v58 }
 0x177   : > { %v935_v32 = vadd.bf16 %v927_v63, %v2772_v22 }
 0x178   : > { %v1086_v18 = vpop.permute.xlu1 %1085 }
 0x179   : > { %v1059_v44 = vpop.permute.xlu0 %1058  ;;  %vm1112_vm12 = vcmp.eq.s32.totalorder %v1086_v18, %v2451_v53  ;;  %v1047_v22 = vadd.bf16 %v1039_v28, %v935_v32 }
 0x17a   : > { %vm1103_vm11 = vcmp.eq.s32.totalorder %v1059_v44, %v2451_v53  ;;  %v1802_v43 = vsel %vm1112_vm12, 1.0, %v2140_v58  ;;  %vm892_vm12 = vcmp.eq.s32.totalorder %v2826_v10, %v2451_v53 }
 0x17b   : > { %v1793_v23 = vsel %vm1103_vm11, 1.0, %v2140_v58  ;;  %v1774_v56 = vsel %vm892_vm12, 1.0, %v2140_v58 }
 0x17c   : > { %v1089_v21 = vpop.permute.xlu1 %1088  ;;  %v1150_v25 = vpack.c.bf16 %v1793_v23, %v1792_v3 }
 0x17d   : > { %vm1113_vm14 = vcmp.eq.s32.totalorder %v1089_v21, %v2451_v53  ;;  %v1065_v42 = vpop.permute.xlu0 %1064 }
 0x17e   : > { %v1803_v35 = vsel %vm1113_vm14, 1.0, %v2140_v58  ;;  %vm1105_vm15 = vcmp.eq.s32.totalorder %v1065_v42, %v2451_v53  ;;  %v1158_v36 = vadd.bf16 %v1150_v25, %v1046_v1 }
 0x17f   : > { %v1155_v2 = vpack.c.bf16 %v1803_v35, %v1802_v43  ;;  %v1795_v57 = vsel %vm1105_vm15, 1.0, %v2140_v58  ;;  %vm994_vm15 = vcmp.eq.s32.totalorder %v2862_v41, %v2451_v53 }
 0x180   : > { %v1151_v11 = vpack.c.bf16 %v1795_v57, %v1794_v48  ;;  %1855 = vmatprep.mubr.bf16.mxu0 %v1158_v36  ;;  %v1780_v23 = vsel %vm994_vm15, 1.0, %v2140_v58 }
 0x181   : > { %v735_v20 = vpop.permute.xlu1 %734  ;;  %v1163_v39 = vadd.bf16 %v1155_v2, %v1051_v54 }
 0x182   : > { %vm771_vm1 = vcmp.eq.s32.totalorder %v735_v20, %v2451_v53  ;;  %v1159_v6 = vadd.bf16 %v1151_v11, %v1047_v22  ;;  %v1071_v11 = vpop.permute.xlu0 %1070 }
 0x183   : > { %v1749_v51 = vsel %vm771_vm1, 1.0, %v2140_v58  ;;  %1864 = vmatmul.mubr.bf16.vlgmr.msra.gmra.mrb[0].mxu1 %v1163_v39  ;;  %vm1107_vm8 = vcmp.eq.s32.totalorder %v1071_v11, %v2451_v53  ;;  %v1178_v11 = vld [vmem:[#allocation2 + $0x60] sm:$0xff] }
 0x184   : > { %v816_v5 = vpack.c.bf16 %v1749_v51, %v1748_v59  ;;  %1856 = vmatmul.mubr.bf16.vlgmr.msra.gmra.mrb[0].mxu0 %v1159_v6  ;;  %v1797_v6 = vsel %vm1107_vm8, 1.0, %v2140_v58 }
 0x185   : > { %v756_v27 = vpop.permute.xlu1 %755 }
 0x186   : > { %v824_v40 = vadd.bf16 %v816_v5, %v2831_v4  ;;  %vm778_vm3 = vcmp.eq.s32.totalorder %v756_v27, %v2451_v53 }
 0x187   : > { %v1756_v61 = vsel %vm778_vm3, 1.0, %v2140_v58 }
 0x188   : > { %v820_v29 = vpack.c.bf16 %v1757_v7, %v1756_v61  ;;  %v1074_v7 = vpop.permute.xlu0 %1073 }
 0x189   : > { %v738_v12 = vpop.permute.xlu1 %737  ;;  %vm1108_vm12 = vcmp.eq.s32.totalorder %v1074_v7, %v2451_v53 }
 0x18a   : > { %v828_v8 = vadd.bf16 %v820_v29, %v2843_v45  ;;  %vm772_vm5 = vcmp.eq.s32.totalorder %v738_v12, %v2451_v53 }
 0x18b   : > { %v1750_v31 = vsel %vm772_vm5, 1.0, %v2140_v58 }
 0x18c   : > { %v817_v4 = vpack.c.bf16 %v1751_v46, %v1750_v31  ;;  %v1098_v46 = vpop.permute.xlu0 %1097 }
 0x18d   : > { %v762_v15 = vpop.permute.xlu1 %761 }
 0x18e   : > { %v825_v62 = vadd.bf16 %v817_v4, %v2874_v60  ;;  %vm780_vm7 = vcmp.eq.s32.totalorder %v762_v15, %v2451_v53  ;;  %v1798_v15 = vsel %vm1108_vm12, 1.0, %v2140_v58 }
 0x18f   : > { %v1758_v13 = vsel %vm780_vm7, 1.0, %v2140_v58 }
 0x190   : > { %v821_v45 = vpack.c.bf16 %v1759_v26, %v1758_v13 }
 0x192   : > { %v829_v55 = vadd.bf16 %v821_v45, %v2891_v33  ;;  %v844_v17 = vpop.permute.xlu1 %843 }
 0x193   : > { %vm882_vm9 = vcmp.eq.s32.totalorder %v844_v17, %v2451_v53 }
 0x194   : > { %v1764_v52 = vsel %vm882_vm9, 1.0, %v2140_v58 }
 0x195   : > { %v928_v60 = vpack.c.bf16 %v1765_v49, %v1764_v52 }
 0x196   : > { %v868_v37 = vpop.permute.xlu1 %867 }
 0x197   : > { %v936_v38 = vadd.bf16 %v928_v60, %v824_v40  ;;  %vm890_vm0 = vcmp.eq.s32.totalorder %v868_v37, %v2451_v53  ;;  %v1176_v60 = vld [vmem:[#allocation2 + $0x50] sm:$0xff] }
 0x198   : > { %v1772_v28 = vsel %vm890_vm0, 1.0, %v2140_v58  ;;  %v1168_v37 = vld [vmem:[#allocation2 + $0x10] sm:$0xff] }
 0x19a   : > { %v871_v18 = vpop.permute.xlu1 %870 }
 0x19b   : > { %vm891_vm14 = vcmp.eq.s32.totalorder %v871_v18, %v2451_v53 }
 0x19c   : > { %v1773_v3 = vsel %vm891_vm14, 1.0, %v2140_v58  ;;  %vm1116_vm14 = vcmp.eq.s32.totalorder %v1098_v46, %v2451_v53 }
 0x19d   : > { %v932_v1 = vpack.c.bf16 %v1773_v3, %v1772_v28 }
 0x19e   : > { %v853_v63 = vpop.permute.xlu1 %852 }
 0x19f   : > { %vm885_vm11 = vcmp.eq.s32.totalorder %v853_v63, %v2451_v53  ;;  %v940_v43 = vadd.bf16 %v932_v1, %v828_v8  ;;  %v1166_v63 = vld [vmem:[#allocation2] sm:$0xff] }
 0x1a0   : > { %v1767_v33 = vsel %vm885_vm11, 1.0, %v2140_v58 }
 0x1a1   : > { %v929_v30 = vpack.c.bf16 %v1767_v33, %v1766_v50  ;;  %v1177_v50 = vld [vmem:[#allocation2 + $0x58] sm:$0xff] }
 0x1a2   : > { %v877_v19 = vpop.permute.xlu1 %876 }
 0x1a3   : > { %v937_v44 = vadd.bf16 %v929_v30, %v825_v62  ;;  %vm893_vm13 = vcmp.eq.s32.totalorder %v877_v19, %v2451_v53 }
 0x1a4   : > { %v1775_v14 = vsel %vm893_vm13, 1.0, %v2140_v58 }
 0x1a5   : > { %v933_v34 = vpack.c.bf16 %v1775_v14, %v1774_v56 }
 0x1a7   : > { %v941_v10 = vadd.bf16 %v933_v34, %v829_v55  ;;  %v959_v24 = vpop.permute.xlu1 %958  ;;  %v1806_v55 = vsel %vm1116_vm14, 1.0, %v2140_v58 }
 0x1a8   : > { %vm995_vm1 = vcmp.eq.s32.totalorder %v959_v24, %v2451_v53 }
 0x1a9   : > { %v1781_v21 = vsel %vm995_vm1, 1.0, %v2140_v58 }
 0x1aa   : > { %v1040_v25 = vpack.c.bf16 %v1781_v21, %v1780_v23 }
 0x1ab   : > { %v980_v41 = vpop.permute.xlu1 %979 }
 0x1ac   : > { %v1048_v32 = vadd.bf16 %v1040_v25, %v936_v38  ;;  %vm1002_vm3 = vcmp.eq.s32.totalorder %v980_v41, %v2451_v53  ;;  %v1174_v38 = vld [vmem:[#allocation2 + $0x40] sm:$0xff] }
 0x1ad   : > { %v1788_v42 = vsel %vm1002_vm3, 1.0, %v2140_v58 }
 0x1ae   : > { %v1044_v35 = vpack.c.bf16 %v1789_v47, %v1788_v42  ;;  %v1170_v47 = vld [vmem:[#allocation2 + $0x20] sm:$0xff] }
 0x1af   : > { %v962_v36 = vpop.permute.xlu1 %961 }
 0x1b0   : > { %v1052_v54 = vadd.bf16 %v1044_v35, %v940_v43  ;;  %vm996_vm5 = vcmp.eq.s32.totalorder %v962_v36, %v2451_v53  ;;  %v1173_v43 = vld [vmem:[#allocation2 + $0x38] sm:$0xff] }
 0x1b1   : > { %v1782_v48 = vsel %vm996_vm5, 1.0, %v2140_v58 }
 0x1b2   : > { %v1041_v2 = vpack.c.bf16 %v1783_v9, %v1782_v48 }
 0x1b3   : > { %v986_v57 = vpop.permute.xlu1 %985 }
 0x1b4   : > { %v1049_v22 = vadd.bf16 %v1041_v2, %v937_v44  ;;  %vm1004_vm7 = vcmp.eq.s32.totalorder %v986_v57, %v2451_v53  ;;  %v1169_v44 = vld [vmem:[#allocation2 + $0x18] sm:$0xff]  ;;  %v1180_v2 = vld [vmem:[#allocation2 + $0x70] sm:$0xff] }
 0x1b5   : > { %v1790_v20 = vsel %vm1004_vm7, 1.0, %v2140_v58 }
 0x1b6   : > { %v1045_v39 = vpack.c.bf16 %v1791_v0, %v1790_v20 }
 0x1b8   : > { %v1053_v59 = vadd.bf16 %v1045_v39, %v941_v10  ;;  %v1068_v51 = vpop.permute.xlu1 %1067  ;;  %v1181_v39 = vld [vmem:[#allocation2 + $0x78] sm:$0xff] }
 0x1b9   : > { %vm1106_vm9 = vcmp.eq.s32.totalorder %v1068_v51, %v2451_v53  ;;  %v1179_v51 = vld [vmem:[#allocation2 + $0x68] sm:$0xff] }
 0x1ba   : > { %v1796_v16 = vsel %vm1106_vm9, 1.0, %v2140_v58 }
 0x1bb   : > { %v1152_v5 = vpack.c.bf16 %v1797_v6, %v1796_v16 }
 0x1bc   : > { %v1092_v27 = vpop.permute.xlu1 %1091 }
 0x1bd   : > { %v1160_v40 = vadd.bf16 %v1152_v5, %v1048_v32  ;;  %vm1114_vm10 = vcmp.eq.s32.totalorder %v1092_v27, %v2451_v53  ;;  %v1172_v32 = vld [vmem:[#allocation2 + $0x30] sm:$0xff] }
 0x1be   : > { %v1804_v29 = vsel %vm1114_vm10, 1.0, %v2140_v58 }
 0x1bf   : > { %1859 = vmatprep.mubr.bf16.mxu0 %v1160_v40 }
 0x1c0   : > { %v1095_v61 = vpop.permute.xlu1 %1094 }
 0x1c1   : > { %vm1115_vm11 = vcmp.eq.s32.totalorder %v1095_v61, %v2451_v53  ;;  %v1381_v61 = vld [vmem:[%s2248_s20 + $0x10] sm:$0xff] (!%p1816_p1) }
 0x1c2   : > { %v1805_v12 = vsel %vm1115_vm11, 1.0, %v2140_v58  ;;  %v1397_v46 = vmax.f32 (!%p1816_p1), %v1381_v61, 1.0 }
 0x1c3   : > { %v1156_v8 = vpack.c.bf16 %v1805_v12, %v1804_v29  ;;  %v1379_v29 = vld [vmem:[%s2248_s20] sm:$0xff] (!%p1816_p1)  ;;  %v1382_v12 = vld [vmem:[%s2248_s20 + $0x18] sm:$0xff] (!%p1816_p1) }
 0x1c4   : > { %v1077_v31 = vpop.permute.xlu1 %1076  ;;  %2004 = vrcp.f32 (!%p1816_p1), %v1397_v46 }
 0x1c5   : > { %vm1109_vm13 = vcmp.eq.s32.totalorder %v1077_v31, %v2451_v53  ;;  %v1164_v4 = vadd.bf16 %v1156_v8, %v1052_v54  ;;  %v1171_v54 = vld [vmem:[#allocation2 + $0x28] sm:$0xff]  ;;  %v2142_v8 = vmov (!%p1816_p1), 0   ;;  %v1395_v31 = vmax.f32 (!%p1816_p1), %v1379_v29, 1.0 }
 0x1c6   : > { %v1799_v62 = vsel %vm1109_vm13, 1.0, %v2140_v58  ;;  %2003 = vset.pattern.permute.xlu1 (!%p1816_p1), %v2142_v8  ;;  %2002 = vset.pattern.permute.xlu0 (!%p1816_p1), %v2142_v8 }
 0x1c7   : > { %v1153_v26 = vpack.c.bf16 %v1799_v62, %v1798_v15  ;;  %1867 = vmatprep.mubr.bf16.mxu1 %v1164_v4  ;;  %v1398_v4 = vmax.f32 (!%p1816_p1), %v1382_v12, 1.0  ;;  %v1380_v15 = vld [vmem:[%s2248_s20 + $0x8] sm:$0xff] (!%p1816_p1)  ;;  %2006 = vrcp.f32 (!%p1816_p1), %v1395_v31 }
 0x1c8   : > { %v1101_v13 = vpop.permute.xlu1 %1100  ;;  %v1396_v62 = vmax.f32 (!%p1816_p1), %v1380_v15, 1.0 }
 0x1c9   : > { %vm1117_vm15 = vcmp.eq.s32.totalorder %v1101_v13, %v2451_v53  ;;  %v1161_v45 = vadd.bf16 %v1153_v26, %v1049_v22  ;;  %v1175_v53 = vld [vmem:[#allocation2 + $0x48] sm:$0xff]  ;;  %v1383_v13 = vld [vmem:[%s2248_s20 + $0x20] sm:$0xff] (!%p1816_p1)  ;;  %2008 = vrcp.f32 (!%p1816_p1), %v1398_v4 }
 0x1ca   : > { %v1807_v17 = vsel %vm1117_vm15, 1.0, %v2140_v58  ;;  %v1167_v58 = vld [vmem:[#allocation2 + $0x8] sm:$0xff]  ;;  %2010 = vrcp.f32 (!%p1816_p1), %v1396_v62 }
 0x1cb   : > { %v1157_v49 = vpack.c.bf16 %v1807_v17, %v1806_v55  ;;  %1860 = vmatmul.mubr.bf16.gmra.mrb[4].mxu0 %v1161_v45  ;;  %v1384_v26 = vld [vmem:[%s2248_s20 + $0x28] sm:$0xff] (!%p1816_p1)  ;;  %v1399_v55 = vmax.f32 (!%p1816_p1), %v1383_v13, 1.0  ;;  %v1386_v17 = vld [vmem:[%s2248_s20 + $0x38] sm:$0xff] (!%p1816_p1) }
 0x1cc   : > { %v1400_v45 = vmax.f32 (!%p1816_p1), %v1384_v26, 1.0 }
 0x1cd   : > { %v1165_v52 = vadd.bf16 %v1157_v49, %v1053_v59  ;;  %v1385_v49 = vld [vmem:[%s2248_s20 + $0x30] sm:$0xff] (!%p1816_p1) }
 0x1ce   : > { %2012 = vrcp.f32 (!%p1816_p1), %v1400_v45 }
 0x1cf   : > { %1868 = vmatmul.mubr.bf16.gmra.mrb[4].mxu1 %v1165_v52  ;;  %v1402_v52 = vmax.f32 (!%p1816_p1), %v1386_v17, 1.0  ;;  %2014 = vrcp.f32 (!%p1816_p1), %v1399_v55 }
 0x1d1   : > { %2016 = vrcp.f32 (!%p1816_p1), %v1402_v52 }
 0x256   : > { %v1865_v18 = vpop.f32.mrb[0].mxu1 }
 0x257   : > { %v1353_v33 = vadd.f32 %v1865_v18, %v1176_v60  ;;  %v1857_v30 = vpop.f32.mrb[0].mxu0  ;;  %v1312_v19 = vpop.f32.mrb[1].mxu1  ;;  %v1401_v60 = vmax.f32 (!%p1816_p1), %v1385_v49, 1.0 }
 0x258   : > { %v1345_v56 = vadd.f32 %v1857_v30, %v1168_v37  ;;  %v1351_v14 = vadd.f32 %v1312_v19, %v1174_v38  ;;  %v1280_v34 = vpop.f32.mrb[1].mxu0  ;;  %v1866_v3 = vpop.f32.mrb[2].mxu1  ;;  %v1388_v37 = vld [vmem:[%s2248_s20 + $0x48] sm:$0xff] (!%p1816_p1)  ;;  %v1387_v38 = vld [vmem:[%s2248_s20 + $0x40] sm:$0xff] (!%p1816_p1)  ;;  %v1390_v30 = vld [vmem:[%s2248_s20 + $0x58] sm:$0xff] (!%p1816_p1) }
 0x259   : > { %1369 = vst [vmem:[#allocation2 + $0x50] sm:$0xff] %v1353_v33  ;;  %v1343_v10 = vadd.f32 %v1280_v34, %v1166_v63  ;;  %v1354_v24 = vadd.f32 %v1866_v3, %v1177_v50  ;;  %v1858_v23 = vpop.f32.mrb[2].mxu0  ;;  %v1315_v28 = vpop.f32.mrb[3].mxu1  ;;  %v1404_v63 = vmax.f32 (!%p1816_p1), %v1388_v37, 1.0  ;;  %2018 = vrcp.f32 (!%p1816_p1), %v1401_v60  ;;  %v1392_v34 = vld [vmem:[%s2248_s20 + $0x68] sm:$0xff] (!%p1816_p1) }
 0x25a   : > { %1361 = vst [vmem:[#allocation2 + $0x10] sm:$0xff] %v1345_v56  ;;  %1367 = vst [vmem:[#allocation2 + $0x40] sm:$0xff] %v1351_v14  ;;  %v1346_v21 = vadd.f32 %v1858_v23, %v1169_v44  ;;  %v1352_v1 = vadd.f32 %v1315_v28, %v1175_v53  ;;  %v1283_v25 = vpop.f32.mrb[3].mxu0  ;;  %v2005_v18 = vpop.eup (!%p1816_p1), %2004  ;;  %v1403_v33 = vmax.f32 (!%p1816_p1), %v1387_v38, 1.0  ;;  %v1389_v44 = vld [vmem:[%s2248_s20 + $0x50] sm:$0xff] (!%p1816_p1)  ;;  %v1406_v56 = vmax.f32 (!%p1816_p1), %v1390_v30, 1.0 }
 0x25b   : > { %1359 = vst [vmem:[#allocation2] sm:$0xff] %v1343_v10  ;;  %1370 = vst [vmem:[#allocation2 + $0x58] sm:$0xff] %v1354_v24  ;;  %v1344_v41 = vadd.f32 %v1283_v25, %v1167_v58  ;;  %v2007_v50 = vpop.eup (!%p1816_p1), %2006  ;;  %1455 = vperm.xlu1 (!%p1816_p1), %2003, %v2005_v18   ;;  %2020 = vrcp.f32 (!%p1816_p1), %v1404_v63  ;;  %v1405_v14 = vmax.f32 (!%p1816_p1), %v1389_v44, 1.0  ;;  %v1391_v58 = vld [vmem:[%s2248_s20 + $0x60] sm:$0xff] (!%p1816_p1)  ;;  %v1408_v24 = vmax.f32 (!%p1816_p1), %v1392_v34, 1.0  ;;  %v1394_v28 = vld [vmem:[%s2248_s20 + $0x78] sm:$0xff] (!%p1816_p1) }
 0x25c   : > { %1362 = vst [vmem:[#allocation2 + $0x18] sm:$0xff] %v1346_v21  ;;  %1368 = vst [vmem:[#allocation2 + $0x48] sm:$0xff] %v1352_v1  ;;  %v2009_v19 = vpop.eup (!%p1816_p1), %2008  ;;  %1445 = vperm.xlu0 (!%p1816_p1), %2002, %v2007_v50   ;;  %2022 = vrcp.f32 (!%p1816_p1), %v1403_v33  ;;  %v1407_v23 = vmax.f32 (!%p1816_p1), %v1391_v58, 1.0  ;;  %v1393_v1 = vld [vmem:[%s2248_s20 + $0x70] sm:$0xff] (!%p1816_p1) }
 0x25d   : > { %1360 = vst [vmem:[#allocation2 + $0x8] sm:$0xff] %v1344_v41  ;;  %v2011_v53 = vpop.eup (!%p1816_p1), %2010  ;;  %2024 = vrcp.f32 (!%p1816_p1), %v1406_v56  ;;  %v1410_v41 = vmax.f32 (!%p1816_p1), %v1394_v28, 1.0 }
 0x25e   : > { %v2013_v3 = vpop.eup (!%p1816_p1), %2012  ;;  %2026 = vrcp.f32 (!%p1816_p1), %v1405_v14 }
 0x25f   : > { %1460 = vperm.xlu1 (!%p1816_p1), %2003, %v2009_v19   ;;  %v2015_v10 = vpop.eup (!%p1816_p1), %2014  ;;  %2028 = vrcp.f32 (!%p1816_p1), %v1408_v24 }
 0x260   : > { %1450 = vperm.xlu0 (!%p1816_p1), %2002, %v2011_v53   ;;  %v2017_v21 = vpop.eup (!%p1816_p1), %2016  ;;  %2030 = vrcp.f32 (!%p1816_p1), %v1407_v23  ;;  %v1421_v60 = vld [vmem:[#allocation2 + $0x50] sm:$0xff] (!%p1816_p1) }
 0x261   : > { %2032 = vrcp.f32 (!%p1816_p1), %v1410_v41  ;;  %v1419_v13 = vld [vmem:[#allocation2 + $0x40] sm:$0xff] (!%p1816_p1) }
 0x262   : > { %v1422_v52 = vld [vmem:[#allocation2 + $0x58] sm:$0xff] (!%p1816_p1) }
 0x263   : > { %1470 = vperm.xlu1 (!%p1816_p1), %2003, %v2013_v3   ;;  %v2019_v25 = vpop.eup (!%p1816_p1), %2018  ;;  %v1420_v26 = vld [vmem:[#allocation2 + $0x48] sm:$0xff] (!%p1816_p1) }
 0x264   : > { %1465 = vperm.xlu0 (!%p1816_p1), %2002, %v2015_v10  }
 0x267   : > { %1480 = vperm.xlu1 (!%p1816_p1), %2003, %v2017_v21  }
 0x268   : > { %1475 = vperm.xlu0 (!%p1816_p1), %2002, %v2019_v25  }
 0x29e   : > { %v1861_v42 = vpop.f32.mrb[4].mxu0 }
 0x29f   : > { %v1349_v35 = vadd.f32 %v1861_v42, %v1172_v32  ;;  %v1296_v36 = vpop.f32.mrb[5].mxu0  ;;  %v1409_v32 = vmax.f32 (!%p1816_p1), %v1393_v1, 1.0 }
 0x2a0   : > { %v1347_v9 = vadd.f32 %v1296_v36, %v1170_v47  ;;  %v1862_v48 = vpop.f32.mrb[6].mxu0  ;;  %v2021_v47 = vpop.eup (!%p1816_p1), %2020 }
 0x2a1   : > { %1365 = vst [vmem:[#allocation2 + $0x30] sm:$0xff] %v1349_v35  ;;  %v1350_v57 = vadd.f32 %v1862_v48, %v1173_v43  ;;  %v1299_v22 = vpop.f32.mrb[7].mxu0  ;;  %v2023_v42 = vpop.eup (!%p1816_p1), %2022  ;;  %1490 = vperm.xlu1 (!%p1816_p1), %2003, %v2021_v47   ;;  %2034 = vrcp.f32 (!%p1816_p1), %v1409_v32 }
 0x2a2   : > { %1363 = vst [vmem:[#allocation2 + $0x20] sm:$0xff] %v1347_v9  ;;  %v1348_v0 = vadd.f32 %v1299_v22, %v1171_v54  ;;  %v1869_v20 = vpop.f32.mrb[4].mxu1  ;;  %1378 = sbr.rel (%p1816_p1) target bundleno = 817 (0x331), region = 40  ;;  %v2025_v43 = vpop.eup (!%p1816_p1), %2024  ;;  %1485 = vperm.xlu0 (!%p1816_p1), %2002, %v2023_v42  }
 0x2a3   : > { %1366 = vst [vmem:[#allocation2 + $0x38] sm:$0xff] %v1350_v57  ;;  %v1357_v6 = vadd.f32 %v1869_v20, %v1180_v2  ;;  %v1328_v59 = vpop.f32.mrb[5].mxu1  ;;  %v2027_v35 = vpop.eup (!%p1816_p1), %2026  ;;  %v1413_v2 = vld [vmem:[#allocation2 + $0x10] sm:$0xff] (!%p1816_p1)  ;;  %v1411_v57 = vld [vmem:[#allocation2] sm:$0xff] (!%p1816_p1) }
 0x2a4   : > { %1364 = vst [vmem:[#allocation2 + $0x28] sm:$0xff] %v1348_v0  ;;  %v1355_v16 = vadd.f32 %v1328_v59, %v1178_v11  ;;  %v1870_v5 = vpop.f32.mrb[6].mxu1  ;;  %v2029_v36 = vpop.eup (!%p1816_p1), %2028 }
 0x2a5   : > { %1373 = vst [vmem:[#allocation2 + $0x70] sm:$0xff] %v1357_v6  ;;  %v1358_v27 = vadd.f32 %v1870_v5, %v1181_v39  ;;  %v1331_v40 = vpop.f32.mrb[7].mxu1  ;;  %1500 = vperm.xlu1 (!%p1816_p1), %2003, %v2025_v43   ;;  %v2031_v54 = vpop.eup (!%p1816_p1), %2030  ;;  %v1414_v39 = vld [vmem:[#allocation2 + $0x18] sm:$0xff] (!%p1816_p1)  ;;  %v1412_v6 = vld [vmem:[#allocation2 + $0x8] sm:$0xff] (!%p1816_p1) }
 0x2a6   : > { %1371 = vst [vmem:[#allocation2 + $0x60] sm:$0xff] %v1355_v16  ;;  %v1356_v7 = vadd.f32 %v1331_v40, %v1179_v51  ;;  %1495 = vperm.xlu0 (!%p1816_p1), %2002, %v2027_v35   ;;  %v2033_v9 = vpop.eup (!%p1816_p1), %2032 }
 0x2a7   : > { %1374 = vst [vmem:[#allocation2 + $0x78] sm:$0xff] %v1358_v27 }
 0x2a8   : > { %1372 = vst [vmem:[#allocation2 + $0x68] sm:$0xff] %v1356_v7  ;;  %v1417_v46 = vld [vmem:[#allocation2 + $0x30] sm:$0xff] (!%p1816_p1) }
 0x2a9   : > { %1510 = vperm.xlu1 %2003, %v2029_v36   ;;  %v1415_v40 = vld [vmem:[#allocation2 + $0x20] sm:$0xff] }
 0x2aa   : > { %1505 = vperm.xlu0 %2002, %v2031_v54   ;;  %v1418_v8 = vld [vmem:[#allocation2 + $0x38] sm:$0xff] }
 0x2ab   : > { %v2035_v48 = vpop.eup %2034  ;;  %v1416_v27 = vld [vmem:[#allocation2 + $0x28] sm:$0xff] }
 0x2ac   : > { %v1425_v14 = vld [vmem:[#allocation2 + $0x70] sm:$0xff] }
 0x2ad   : > { %1520 = vperm.xlu1 %2003, %v2033_v9   ;;  %v1423_v33 = vld [vmem:[#allocation2 + $0x60] sm:$0xff] }
 0x2ae   : > { %1515 = vperm.xlu0 %2002, %v2035_v48   ;;  %v1426_v56 = vld [vmem:[#allocation2 + $0x78] sm:$0xff] }
 0x2af   : > { %v1424_v50 = vld [vmem:[#allocation2 + $0x68] sm:$0xff] }
 0x2da   : > { %v1456_v22 = vpop.permute.xlu1 %1455 }
 0x2db   : > { %v1525_v11 = vmul.f32 %v1456_v22, %v1413_v2  ;;  %v1446_v0 = vpop.permute.xlu0 %1445 }
 0x2dc   : > { %v1523_v20 = vmul.f32 %v1446_v0, %v1411_v57 }
 0x2dd   : > { %1541 = vst [vmem:[%s2255_s23 + $0x10] sm:$0xff] %v1525_v11 }
 0x2de   : > { %1539 = vst [vmem:[%s2255_s23] sm:$0xff] %v1523_v20  ;;  %v1461_v59 = vpop.permute.xlu1 %1460 }
 0x2df   : > { %v1526_v51 = vmul.f32 %v1461_v59, %v1414_v39  ;;  %v1451_v16 = vpop.permute.xlu0 %1450 }
 0x2e0   : > { %v1524_v5 = vmul.f32 %v1451_v16, %v1412_v6 }
 0x2e1   : > { %1542 = vst [vmem:[%s2255_s23 + $0x18] sm:$0xff] %v1526_v51 }
 0x2e2   : > { %1540 = vst [vmem:[%s2255_s23 + $0x8] sm:$0xff] %v1524_v5  ;;  %v1471_v7 = vpop.permute.xlu1 %1470 }
 0x2e3   : > { %v1528_v61 = vmul.f32 %v1471_v7, %v1416_v27  ;;  %v1466_v29 = vpop.permute.xlu0 %1465 }
 0x2e4   : > { %v1527_v12 = vmul.f32 %v1466_v29, %v1415_v40 }
 0x2e5   : > { %1544 = vst [vmem:[%s2255_s23 + $0x28] sm:$0xff] %v1528_v61 }
 0x2e6   : > { %1543 = vst [vmem:[%s2255_s23 + $0x20] sm:$0xff] %v1527_v12  ;;  %v1481_v31 = vpop.permute.xlu1 %1480 }
 0x2e7   : > { %v1530_v4 = vmul.f32 %v1481_v31, %v1418_v8  ;;  %v1476_v15 = vpop.permute.xlu0 %1475 }
 0x2e8   : > { %v1529_v62 = vmul.f32 %v1476_v15, %v1417_v46 }
 0x2e9   : > { %1546 = vst [vmem:[%s2255_s23 + $0x38] sm:$0xff] %v1530_v4 }
 0x2ea   : > { %1545 = vst [vmem:[%s2255_s23 + $0x30] sm:$0xff] %v1529_v62 }
 0x320   : > { %v1491_v45 = vpop.permute.xlu1 %1490 }
 0x321   : > { %v1532_v55 = vmul.f32 %v1491_v45, %v1420_v26  ;;  %v1486_v17 = vpop.permute.xlu0 %1485 }
 0x322   : > { %v1531_v49 = vmul.f32 %v1486_v17, %v1419_v13 }
 0x323   : > { %1548 = vst [vmem:[%s2255_s23 + $0x48] sm:$0xff] %v1532_v55 }
 0x324   : > { %1547 = vst [vmem:[%s2255_s23 + $0x40] sm:$0xff] %v1531_v49  ;;  %v1501_v37 = vpop.permute.xlu1 %1500 }
 0x325   : > { %v1534_v38 = vmul.f32 %v1501_v37, %v1422_v52  ;;  %v1496_v18 = vpop.permute.xlu0 %1495 }
 0x326   : > { %v1533_v63 = vmul.f32 %v1496_v18, %v1421_v60 }
 0x327   : > { %1550 = vst [vmem:[%s2255_s23 + $0x58] sm:$0xff] %v1534_v38 }
 0x328   : > { %1549 = vst [vmem:[%s2255_s23 + $0x50] sm:$0xff] %v1533_v63  ;;  %v1511_v30 = vpop.permute.xlu1 %1510 }
 0x329   : > { %v1536_v19 = vmul.f32 %v1511_v30, %v1424_v50  ;;  %v1506_v44 = vpop.permute.xlu0 %1505 }
 0x32a   : > { %v1535_v53 = vmul.f32 %v1506_v44, %v1423_v33 }
 0x32b   : > { %1552 = vst [vmem:[%s2255_s23 + $0x68] sm:$0xff] %v1536_v19 }
 0x32c   : > { %1551 = vst [vmem:[%s2255_s23 + $0x60] sm:$0xff] %v1535_v53  ;;  %v1521_v34 = vpop.permute.xlu1 %1520 }
 0x32d   : > { %v1538_v3 = vmul.f32 %v1521_v34, %v1426_v56  ;;  %v1516_v58 = vpop.permute.xlu0 %1515 }
 0x32e   : > { %v1537_v10 = vmul.f32 %v1516_v58, %v1425_v14 }
 0x32f   : > { %1554 = vst [vmem:[%s2255_s23 + $0x78] sm:$0xff] %v1538_v3 }
 0x330   : > { %1553 = vst [vmem:[%s2255_s23 + $0x70] sm:$0xff] %v1537_v10 }
 0x331 PF: > { %s1822_s15 = sshll.u32 %s2118_s16, 11  ;;  %s1569_s6 = sshll.u32 %s2255_s23, 4  ;;  %s3049_s6 = int_to_ptr.vmem [resolvable:$true] %s1569_s6 }
 0x332   : > { %s3046_s5 = scalar_lea.hbm %s3108_s3, %s1822_s15  ;;  %s3114_s7 = sand.u32 1, %s2106_s13  }
 0x333   : > { %s3053_s8 = scalar_lea.sflag [#allocation4], %s3114_s7  ;;  %s2036_s9 = scalar_lea.vmem %s3049_s6, 2048 }
 0x334   : > { %p2037_p2 = scmp.ne.s32.totalorder %s3049_s6, %s2036_s9  ;;  %s2143_s16 = smov [#allocation3]  }
 0x335   : > { %s2040_s10 = sshll.u32 %s2143_s16, 4  ;;  %s2041_s10 = int_to_ptr.vmem [resolvable:$false] %s2040_s10 }
 0x336   : > { %p2038_p4 = pnand %p2037_p2, %p2215_p3  ;;  %s2042_s11 = scalar_lea.vmem %s2041_s10, 4096 }
 0x337   : > { %p2043_p6 = scmp.lt.s32.totalorder %s3049_s6, %s2041_s10  ;;  %p2044_p7 = scmp.lt.s32.totalorder %s2042_s11, %s2036_s9 }
 0x338   : > { %p2039_p5 = pneg %p2038_p4 }
 0x339   : > { %p2045_p8 = por %p2044_p7, %p2043_p6 }
 0x33b   : > { %p2046_p10 = pnand %p2045_p8, %p2039_p5 }
 0x33d   : > { %2049 = shalt.err (!%p2046_p10)
}
 0x33e   : > { %s2050_s23 = scalar_lea.hbm %s3046_s5, 2048  ;;  %s2054_s26 = scalar_lea.hbm %s3108_s3, 4096 }
 0x33f   : > { %p2051_p11 = scmp.ne.s32.totalorder %s3046_s5, %s2050_s23  ;;  %p2055_p0 = scmp.lt.u32.totalorder %s3046_s5, %s3108_s3 }
 0x340   : > { %p2056_p1 = scmp.lt.u32.totalorder %s2054_s26, %s2050_s23  ;;  %p2058_p4 = scmp.lt.u32.totalorder %s2050_s23, %s3046_s5 }
 0x341   : > { %p2052_p12 = pnand %p2051_p11, %p2215_p3 }
 0x342   : > { %p2057_p2 = por %p2056_p1, %p2055_p0 }
 0x343   : > { %p2053_p13 = pneg %p2052_p12 }
 0x344   : > { %p2059_p5 = por %p2058_p4, %p2057_p2 }
 0x346   : > { %p2060_p6 = pnand %p2059_p5, %p2053_p13 }
 0x348   : > { %2063 = shalt.err (!%p2060_p6)
}
 0x349   : > { %s2144_s15 = smov 128   ;;  %s2145_s29 = smov 8  }
 0x34a   : > { %1887 = dma.vmem_to_hbm [thread:$0]  (%p2215_p3), %s3049_s6, 2048, %s3046_s5, %s3053_s8, %s2144_s15, %s2144_s15, %s2145_s29  }
 0x34b PF: > { %p1893_p7 = scmp.ge.s32.totalorder %s2130_s19, 2  ;;  %s1584_s4 = sand.u32 1, %s2102_s12  }
 0x34c   : > { %s1585_s7 = scalar_lea.sflag [#allocation4], %s1584_s4 }
 0x34d   : > { %p1890_p8 = pnand %p1893_p7, %p2225_p9 }
 0x34f   : > { %2097 = dma.done.wait (!%p1890_p8), %s1585_s7, 2048  }
 0x350   : > { %2099 = vsyncadd (!%p1890_p8), %s1585_s7, 4294965248  ;;  %s16_s19 = sadd.s32 1, %s2130_s19   ;;  %s3115_s24 = sld [smem:[#allocation6_spill]] }
 0x351   : > { %p13_p10 = scmp.ge.s32.totalorder %s16_s19, 6   ;;  %s3116_s12 = smov %s2106_s13 }
 0x352   : > { %s3117_s13 = smov %s2110_s14  ;;  %s3118_s14 = smov %s2233_s28 }
 0x353   : > { %s3119_s15 = smov %s2122_s17  ;;  %s3120_s16 = smov %s2126_s18 }
 0x354   : > { %s3121_s17 = smov %s3124_s22  ;;  %15 = sbr.rel (!%p13_p10) target bundleno = 5 (0x5), region = 81 }
 0x356   : > { %s3122_s18 = smov %s3115_s24 }
 0x35b   :  { %1590 = vsyncpa [#allocation4], 1 }
 0x35c   :  { %1592 = vsyncpa [#allocation4 + $0x1], 1 }

</bundles_post_ra>
